<compile_context>
chip_gen: v7x
topology: tpu7x:2x2x1
jax: 0.10.0
libtpu: 0.0.40
codegen_flags: <defaults>
</compile_context>

<pallas_src>
import math

import jax
import jax.numpy as jnp
from jax.experimental import pallas as pl
from jax.experimental.pallas import tpu as pltpu

N_EMBD = 128
N_HEAD = 4
HEAD_DIM = N_EMBD // N_HEAD
DENSE_MULT = 4
EPS = 1e-5

_MIB = 1024 * 1024


def _layernorm(x, w, eps):
    # F.layer_norm over last dim, biased variance, no bias term (bias=False).
    mu = jnp.mean(x, axis=-1, keepdims=True)
    xc = x - mu
    var = jnp.mean(xc * xc, axis=-1, keepdims=True)
    return xc * jax.lax.rsqrt(var + eps) * w


def _gelu_exact(x):
    # nn.GELU() default (approximate='none'): 0.5*x*(1+erf(x/sqrt(2)))
    # TODO(synk): on v6e/v7x (bf16 VALU) this elementwise block could run in
    # bf16 to roughly halve VALU issue count on the (M, 4C) activation; kept
    # f32 so one kernel is correct and lowerable on v5e (no bf16 VPU/EUP) and
    # stays well inside the error budget vs the f32 reference.
    return 0.5 * x * (1.0 + jax.lax.erf(x * (2.0 ** -0.5)))


def transformer_block_kernel(x_ref, ln1_w_ref, ln2_w_ref,
                             w_qkv_ref, w_attn_proj_ref,
                             w_fc_ref, w_mlp_proj_ref,
                             o_ref):
    BB, T, C = x_ref.shape
    M = BB * T

    # Merging (BB, T) into the matmul M-dimension is a free view when T is a
    # multiple of 8 (f32 sublane); otherwise Mosaic inserts a relayout copy
    # (still correct, just slower).
    x = x_ref[...].astype(jnp.float32).reshape(M, C)             # (M, C)

    # ---- LN1 (f32) + fused QKV projection (bf16 operands, f32 accumulate).
    #      1/sqrt(head_dim) is pre-folded into the q columns of w_qkv.
    h = _layernorm(x, ln1_w_ref[...], EPS)
    qkv = jnp.dot(h.astype(jnp.bfloat16), w_qkv_ref[...],
                  preferred_element_type=jnp.float32)            # (M, 3C)

    q = qkv[:, 0:C].reshape(BB, T, C)
    k = qkv[:, C:2 * C].reshape(BB, T, C)
    v = qkv[:, 2 * C:3 * C].reshape(BB, T, C)

    # ---- causal multi-head attention: static unroll over 4 heads, batched
    #      over BB inside each einsum; softmax in f32.
    row = jax.lax.broadcasted_iota(jnp.int32, (T, T), 0)
    col = jax.lax.broadcasted_iota(jnp.int32, (T, T), 1)
    causal = (row >= col)[None, :, :]                            # (1, T, T)
    neg_inf = jnp.float32(-jnp.inf)

    head_outs = []
    for hh in range(N_HEAD):
        s, e = hh * HEAD_DIM, (hh + 1) * HEAD_DIM
        qh = q[:, :, s:e].astype(jnp.bfloat16)                   # (BB, T, hd)
        kh = k[:, :, s:e].astype(jnp.bfloat16)
        vh = v[:, :, s:e].astype(jnp.bfloat16)
        sc = jnp.einsum('bqd,bkd->bqk', qh, kh,
                        preferred_element_type=jnp.float32)      # (BB, T, T)
        sc = jnp.where(causal, sc, neg_inf)
        sc = sc - jnp.max(sc, axis=-1, keepdims=True)
        p = jnp.exp(sc)
        denom = jnp.sum(p, axis=-1, keepdims=True)
        p = p * pl.reciprocal(denom, approx=True)                # EUP, not VALU
        head_outs.append(
            jnp.einsum('bqk,bkd->bqd', p.astype(jnp.bfloat16), vh,
                       preferred_element_type=jnp.float32))      # (BB, T, hd)

    # In-register concat over heads (no VMEM scratch round-trip, no masked
    # partial stores) -> single K=128 output projection.
    y = jnp.concatenate(head_outs, axis=-1).reshape(M, C)        # (M, C) f32
    attn_out = jnp.dot(y.astype(jnp.bfloat16), w_attn_proj_ref[...],
                       preferred_element_type=jnp.float32)       # (M, C)
    x1 = x + attn_out                                            # residual 1

    # ---- LN2 + MLP (dropout = identity at inference)
    h2 = _layernorm(x1, ln2_w_ref[...], EPS)
    f = jnp.dot(h2.astype(jnp.bfloat16), w_fc_ref[...],
                preferred_element_type=jnp.float32)              # (M, 4C)
    g = _gelu_exact(f)
    m = jnp.dot(g.astype(jnp.bfloat16), w_mlp_proj_ref[...],
                preferred_element_type=jnp.float32)              # (M, C)

    o_ref[...] = (x1 + m).astype(o_ref.dtype).reshape(BB, T, C)  # residual 2


def _vmem_capacity_bytes():
    try:
        return int(pltpu.get_tpu_info().vmem_capacity_bytes)
    except Exception:
        return 64 * _MIB          # conservative (v7x per-TensorCore VMEM)


def _choose_block_batch(B, T, vmem_budget_bytes, token_cap):
    """Largest divisor bb of B whose per-step working set fits the VMEM budget
    and bb*T <= token_cap.  One big step amortizes the ~0.35 us per-grid-step
    pipeline overhead; at C=128 that overhead, not the MXU, is the limiter."""
    # Conservative per-step estimate: ~12 KiB/token of f32 intermediates
    # (x, h, qkv, q/k/v, head outputs, x1, h2, f, g, m) + ~2 KiB/token for the
    # double-buffered x/out slabs, plus per-sequence score temporaries and the
    # (double-buffered) bf16 weights.
    per_token = 14 * 1024
    per_seq = 4 * N_HEAD * T * T * 4
    fixed = 2 * _MIB
    bb = 1
    for d in range(1, B + 1):
        if B % d:
            continue
        if d * T > token_cap:
            continue
        if fixed + d * T * per_token + d * per_seq <= vmem_budget_bytes:
            bb = d
    return bb


def transformer_block(x, params):
    B, T, C = x.shape
    assert C == N_EMBD
    ln1_w, ln2_w, w_qkv, w_attn_proj, w_fc, w_mlp_proj = params

    # Fold the attention scale into the q columns of w_qkv (one-time weight
    # op), then cast all matmul weights to bf16 once (MXU-native operands).
    scale = 1.0 / math.sqrt(HEAD_DIM)
    w_qkv = jnp.concatenate([w_qkv[:, :C] * scale, w_qkv[:, C:]], axis=1)
    w_qkv = w_qkv.astype(jnp.bfloat16)
    w_attn_proj = w_attn_proj.astype(jnp.bfloat16)
    w_fc = w_fc.astype(jnp.bfloat16)
    w_mlp_proj = w_mlp_proj.astype(jnp.bfloat16)

    # Generation-aware slab sizing: 64-MiB-VMEM chips (v7x) cap at 2048
    # tokens/step, 128-MiB chips (v5e/v6e) at 4096.  Raise the scoped VMEM
    # limit explicitly (v5e default is only 16 MiB).
    capacity = _vmem_capacity_bytes()
    token_cap = 2048 if capacity <= 64 * _MIB else 4096
    vmem_limit = int(max(32 * _MIB, min(capacity - 8 * _MIB, 112 * _MIB)))
    bb = _choose_block_batch(B, T, vmem_limit, token_cap)
    grid = (B // bb,)

    def full2d(shape):
        return pl.BlockSpec(shape, lambda i: (0, 0))

    # Advisory cost for XLA's scheduler.
    flops = (2 * B * T * C * (3 * C + C + 2 * DENSE_MULT * C)
             + 4 * B * N_HEAD * T * T * HEAD_DIM)
    transcendentals = B * N_HEAD * T * T + B * T * DENSE_MULT * C
    bytes_accessed = (2 * B * T * C * 4
                      + 2 * C * C * (3 + 1 + 2 * DENSE_MULT)
                      + 2 * C * 4)
    cost = pl.CostEstimate(flops=flops, transcendentals=transcendentals,
                           bytes_accessed=bytes_accessed)

    return pl.pallas_call(
        transformer_block_kernel,
        out_shape=jax.ShapeDtypeStruct((B, T, C), x.dtype),
        grid=grid,
        in_specs=[
            pl.BlockSpec((bb, T, C), lambda i: (i, 0, 0)),     # x
            full2d((1, C)),                                    # ln1 weight
            full2d((1, C)),                                    # ln2 weight
            full2d((C, 3 * C)),                                # qkv weight (in,out)
            full2d((C, C)),                                    # attn proj weight
            full2d((C, DENSE_MULT * C)),                       # mlp fc weight
            full2d((DENSE_MULT * C, C)),                       # mlp proj weight
        ],
        out_specs=pl.BlockSpec((bb, T, C), lambda i: (i, 0, 0)),
        compiler_params=pltpu.CompilerParams(
            dimension_semantics=("parallel",),
            vmem_limit_bytes=vmem_limit),
        cost_estimate=cost,
    )(x, ln1_w, ln2_w, w_qkv, w_attn_proj, w_fc, w_mlp_proj)


def make_params(key):
    k1, k2, k3, k4 = jax.random.split(key, 4)
    std = 0.02
    ln1_w = jnp.ones((1, N_EMBD), jnp.float32)
    ln2_w = jnp.ones((1, N_EMBD), jnp.float32)
    # stored (in_features, out_features) == PyTorch weight.T
    w_qkv = std * jax.random.normal(k1, (N_EMBD, 3 * N_EMBD), jnp.float32)
    w_attn_proj = std * jax.random.normal(k2, (N_EMBD, N_EMBD), jnp.float32)
    w_fc = std * jax.random.normal(k3, (N_EMBD, DENSE_MULT * N_EMBD), jnp.float32)
    w_mlp_proj = std * jax.random.normal(k4, (DENSE_MULT * N_EMBD, N_EMBD), jnp.float32)
    return (ln1_w, ln2_w, w_qkv, w_attn_proj, w_fc, w_mlp_proj)


def reference_block(x, params):
    """Pure-JAX f32 reference of the PyTorch forward (eval mode)."""
    ln1_w, ln2_w, w_qkv, w_attn_proj, w_fc, w_mlp_proj = params
    B, T, C = x.shape

    def ln(v, w):
        mu = jnp.mean(v, axis=-1, keepdims=True)
        vc = v - mu
        var = jnp.mean(vc * vc, axis=-1, keepdims=True)
        return vc / jnp.sqrt(var + EPS) * w[0]

    h = ln(x, ln1_w)
    qkv = h @ w_qkv
    q, k, v = jnp.split(qkv, 3, axis=-1)
    q = q.reshape(B, T, N_HEAD, HEAD_DIM).transpose(0, 2, 1, 3)
    k = k.reshape(B, T, N_HEAD, HEAD_DIM).transpose(0, 2, 1, 3)
    v = v.reshape(B, T, N_HEAD, HEAD_DIM).transpose(0, 2, 1, 3)
    scores = jnp.einsum("bhqd,bhkd->bhqk", q, k) / (HEAD_DIM ** 0.5)
    causal = jnp.tril(jnp.ones((T, T), bool))
    scores = jnp.where(causal[None, None], scores, -jnp.inf)
    p = jax.nn.softmax(scores, axis=-1)
    y = jnp.einsum("bhqk,bhkd->bhqd", p, v)
    y = y.transpose(0, 2, 1, 3).reshape(B, T, C)
    x1 = x + y @ w_attn_proj

    h2 = ln(x1, ln2_w)
    f = h2 @ w_fc
    g = 0.5 * f * (1.0 + jax.lax.erf(f * (2.0 ** -0.5)))
    return x1 + g @ w_mlp_proj


if __name__ == "__main__":
    key = jax.random.PRNGKey(0)
    kx, kp = jax.random.split(key)
    B, T = 2, 8
    x = jax.random.normal(kx, (B, T, N_EMBD), jnp.float32)
    params = make_params(kp)

    out = jax.block_until_ready(transformer_block(x, params))
    ref = reference_block(x, params)

    assert out.shape == (B, T, N_EMBD)
    err = float(jnp.max(jnp.abs(out - ref)))
    # bf16 matmul operands / f32 accumulation: small numeric delta vs f32 ref.
    assert jnp.allclose(out, ref, atol=5e-3, rtol=5e-3), err
    print("KERNEL_OK")
</pallas_src>

<mosaic_0001>
module attributes {stable_mosaic.version = 11 : i64} {
  func.func @transformer_block_kernel(%arg0: i32, %arg1: memref<2x8x128xf32, #tpu.memory_space<vmem>>, %arg2: memref<1x128xf32, #tpu.memory_space<vmem>>, %arg3: memref<1x128xf32, #tpu.memory_space<vmem>>, %arg4: memref<128x384xbf16, #tpu.memory_space<vmem>>, %arg5: memref<128x128xbf16, #tpu.memory_space<vmem>>, %arg6: memref<128x512xbf16, #tpu.memory_space<vmem>>, %arg7: memref<512x128xbf16, #tpu.memory_space<vmem>>, %arg8: memref<2x8x128xf32, #tpu.memory_space<vmem>>) attributes {dimension_semantics = [#tpu.dimension_semantics<parallel>], iteration_bounds = array<i64: 1>, scalar_prefetch = 0 : i64, scratch_operands = 0 : i64, tpu.core_type = #tpu.core_type<tc>, window_params = [{transform_indices = @transform_0, window_bounds = array<i64: 2, 8, 128>}, {pipeline_mode = #tpu.pipeline_mode<synchronous>, transform_indices = @transform_1, window_bounds = array<i64: 1, 128>}, {pipeline_mode = #tpu.pipeline_mode<synchronous>, transform_indices = @transform_2, window_bounds = array<i64: 1, 128>}, {pipeline_mode = #tpu.pipeline_mode<synchronous>, transform_indices = @transform_3, window_bounds = array<i64: 128, 384>}, {pipeline_mode = #tpu.pipeline_mode<synchronous>, transform_indices = @transform_4, window_bounds = array<i64: 128, 128>}, {pipeline_mode = #tpu.pipeline_mode<synchronous>, transform_indices = @transform_5, window_bounds = array<i64: 128, 512>}, {pipeline_mode = #tpu.pipeline_mode<synchronous>, transform_indices = @transform_6, window_bounds = array<i64: 512, 128>}, {transform_indices = @transform_7, window_bounds = array<i64: 2, 8, 128>}]} {
    %c0 = arith.constant 0 : index
    %c0_0 = arith.constant 0 : index
    %c0_1 = arith.constant 0 : index
    %0 = vector.load %arg1[%c0, %c0_0, %c0_1] : memref<2x8x128xf32, #tpu.memory_space<vmem>>, vector<2x8x128xf32>
    %1 = vector.shape_cast %0 : vector<2x8x128xf32> to vector<16x128xf32>
    %c0_2 = arith.constant 0 : index
    %c0_3 = arith.constant 0 : index
    %2 = vector.load %arg2[%c0_2, %c0_3] : memref<1x128xf32, #tpu.memory_space<vmem>>, vector<1x128xf32>
    %cst = arith.constant dense<0.000000e+00> : vector<16xf32>
    %3 = vector.multi_reduction <add>, %1, %cst [1] : vector<16x128xf32> to vector<16xf32>
    %4 = vector.shape_cast %3 : vector<16xf32> to vector<16x1xf32>
    %cst_4 = arith.constant 1.280000e+02 : f32
    %5 = vector.broadcast %cst_4 : f32 to vector<16x1xf32>
    %6 = arith.divf %4, %5 : vector<16x1xf32>
    %7 = vector.broadcast %6 : vector<16x1xf32> to vector<16x128xf32>
    %8 = arith.subf %1, %7 : vector<16x128xf32>
    %9 = arith.mulf %8, %8 : vector<16x128xf32>
    %cst_5 = arith.constant dense<0.000000e+00> : vector<16xf32>
    %10 = vector.multi_reduction <add>, %9, %cst_5 [1] : vector<16x128xf32> to vector<16xf32>
    %11 = vector.shape_cast %10 : vector<16xf32> to vector<16x1xf32>
    %cst_6 = arith.constant 1.280000e+02 : f32
    %12 = vector.broadcast %cst_6 : f32 to vector<16x1xf32>
    %13 = arith.divf %11, %12 : vector<16x1xf32>
    %cst_7 = arith.constant 9.99999974E-6 : f32
    %14 = vector.broadcast %cst_7 : f32 to vector<16x1xf32>
    %15 = arith.addf %13, %14 : vector<16x1xf32>
    %16 = math.rsqrt %15 : vector<16x1xf32>
    %17 = vector.broadcast %16 : vector<16x1xf32> to vector<16x128xf32>
    %18 = arith.mulf %8, %17 : vector<16x128xf32>
    %19 = vector.broadcast %2 : vector<1x128xf32> to vector<16x128xf32>
    %20 = arith.mulf %18, %19 : vector<16x128xf32>
    %21 = arith.truncf %20 : vector<16x128xf32> to vector<16x128xbf16>
    %c0_8 = arith.constant 0 : index
    %c0_9 = arith.constant 0 : index
    %22 = vector.load %arg4[%c0_8, %c0_9] : memref<128x384xbf16, #tpu.memory_space<vmem>>, vector<128x384xbf16>
    %cst_10 = arith.constant dense<0.000000e+00> : vector<16x384xf32>
    %23 = tpu.matmul %21, %22, %cst_10 {dimension_numbers = #tpu.dot_dimension_numbers<[1], [0], [0], [1], [0, 0, 1, 1], [], []>} : vector<16x128xbf16>, vector<128x384xbf16>, vector<16x384xf32> -> vector<16x384xf32>
    %24 = vector.extract_strided_slice %23 {offsets = [0, 0], sizes = [16, 128], strides = [1, 1]} : vector<16x384xf32> to vector<16x128xf32>
    %25 = vector.shape_cast %24 : vector<16x128xf32> to vector<2x8x128xf32>
    %26 = vector.extract_strided_slice %23 {offsets = [0, 128], sizes = [16, 128], strides = [1, 1]} : vector<16x384xf32> to vector<16x128xf32>
    %27 = vector.shape_cast %26 : vector<16x128xf32> to vector<2x8x128xf32>
    %28 = vector.extract_strided_slice %23 {offsets = [0, 256], sizes = [16, 128], strides = [1, 1]} : vector<16x384xf32> to vector<16x128xf32>
    %29 = vector.shape_cast %28 : vector<16x128xf32> to vector<2x8x128xf32>
    %30 = tpu.iota {dimensions = array<i32: 0>} : vector<8x8xi32>
    %31 = tpu.iota {dimensions = array<i32: 1>} : vector<8x8xi32>
    %32 = arith.cmpi sge, %30, %31 : vector<8x8xi32>
    %33 = vector.shape_cast %32 : vector<8x8xi1> to vector<1x8x8xi1>
    %34 = vector.extract_strided_slice %25 {offsets = [0, 0, 0], sizes = [2, 8, 32], strides = [1, 1, 1]} : vector<2x8x128xf32> to vector<2x8x32xf32>
    %35 = arith.truncf %34 : vector<2x8x32xf32> to vector<2x8x32xbf16>
    %36 = vector.extract_strided_slice %27 {offsets = [0, 0, 0], sizes = [2, 8, 32], strides = [1, 1, 1]} : vector<2x8x128xf32> to vector<2x8x32xf32>
    %37 = arith.truncf %36 : vector<2x8x32xf32> to vector<2x8x32xbf16>
    %38 = vector.extract_strided_slice %29 {offsets = [0, 0, 0], sizes = [2, 8, 32], strides = [1, 1, 1]} : vector<2x8x128xf32> to vector<2x8x32xf32>
    %39 = arith.truncf %38 : vector<2x8x32xf32> to vector<2x8x32xbf16>
    "tpu.trace_start"() <{level = 10 : i32, message = "bqd,bkd->bqk"}> : () -> ()
    %cst_11 = arith.constant dense<0.000000e+00> : vector<2x8x8xf32>
    %40 = tpu.matmul %35, %37, %cst_11 {dimension_numbers = #tpu.dot_dimension_numbers<[2], [2], [1], [1], [0, 0, 0, 1, 1, 1], [0], [0]>} : vector<2x8x32xbf16>, vector<2x8x32xbf16>, vector<2x8x8xf32> -> vector<2x8x8xf32>
    %cst_12 = arith.constant 0xFF800000 : f32
    "tpu.trace_stop"() : () -> ()
    %41 = vector.shape_cast %33 : vector<1x8x8xi1> to vector<1x8x8xi1>
    %42 = vector.broadcast %41 : vector<1x8x8xi1> to vector<2x8x8xi1>
    %43 = vector.broadcast %cst_12 : f32 to vector<2x8x8xf32>
    %44 = arith.select %42, %40, %43 : vector<2x8x8xi1>, vector<2x8x8xf32>
    %cst_13 = arith.constant dense<0xFF800000> : vector<2x8xf32>
    %45 = vector.multi_reduction <maximumf>, %44, %cst_13 [2] : vector<2x8x8xf32> to vector<2x8xf32>
    %46 = vector.shape_cast %45 : vector<2x8xf32> to vector<2x8x1xf32>
    %47 = vector.broadcast %46 : vector<2x8x1xf32> to vector<2x8x8xf32>
    %48 = arith.subf %44, %47 : vector<2x8x8xf32>
    %49 = math.exp %48 : vector<2x8x8xf32>
    %cst_14 = arith.constant dense<0.000000e+00> : vector<2x8xf32>
    %50 = vector.multi_reduction <add>, %49, %cst_14 [2] : vector<2x8x8xf32> to vector<2x8xf32>
    %51 = vector.shape_cast %50 : vector<2x8xf32> to vector<2x8x1xf32>
    %52 = tpu.reciprocal %51 {approx = true} : vector<2x8x1xf32> -> vector<2x8x1xf32>
    %53 = vector.broadcast %52 : vector<2x8x1xf32> to vector<2x8x8xf32>
    %54 = arith.mulf %49, %53 : vector<2x8x8xf32>
    %55 = arith.truncf %54 : vector<2x8x8xf32> to vector<2x8x8xbf16>
    "tpu.trace_start"() <{level = 10 : i32, message = "bqk,bkd->bqd"}> : () -> ()
    %cst_15 = arith.constant dense<0.000000e+00> : vector<2x8x32xf32>
    %56 = tpu.matmul %55, %39, %cst_15 {dimension_numbers = #tpu.dot_dimension_numbers<[2], [1], [1], [2], [0, 0, 0, 1, 1, 2], [0], [0]>} : vector<2x8x8xbf16>, vector<2x8x32xbf16>, vector<2x8x32xf32> -> vector<2x8x32xf32>
    "tpu.trace_stop"() : () -> ()
    %57 = vector.extract_strided_slice %25 {offsets = [0, 0, 32], sizes = [2, 8, 32], strides = [1, 1, 1]} : vector<2x8x128xf32> to vector<2x8x32xf32>
    %58 = arith.truncf %57 : vector<2x8x32xf32> to vector<2x8x32xbf16>
    %59 = vector.extract_strided_slice %27 {offsets = [0, 0, 32], sizes = [2, 8, 32], strides = [1, 1, 1]} : vector<2x8x128xf32> to vector<2x8x32xf32>
    %60 = arith.truncf %59 : vector<2x8x32xf32> to vector<2x8x32xbf16>
    %61 = vector.extract_strided_slice %29 {offsets = [0, 0, 32], sizes = [2, 8, 32], strides = [1, 1, 1]} : vector<2x8x128xf32> to vector<2x8x32xf32>
    %62 = arith.truncf %61 : vector<2x8x32xf32> to vector<2x8x32xbf16>
    "tpu.trace_start"() <{level = 10 : i32, message = "bqd,bkd->bqk"}> : () -> ()
    %cst_16 = arith.constant dense<0.000000e+00> : vector<2x8x8xf32>
    %63 = tpu.matmul %58, %60, %cst_16 {dimension_numbers = #tpu.dot_dimension_numbers<[2], [2], [1], [1], [0, 0, 0, 1, 1, 1], [0], [0]>} : vector<2x8x32xbf16>, vector<2x8x32xbf16>, vector<2x8x8xf32> -> vector<2x8x8xf32>
    %cst_17 = arith.constant 0xFF800000 : f32
    "tpu.trace_stop"() : () -> ()
    %64 = vector.shape_cast %33 : vector<1x8x8xi1> to vector<1x8x8xi1>
    %65 = vector.broadcast %64 : vector<1x8x8xi1> to vector<2x8x8xi1>
    %66 = vector.broadcast %cst_17 : f32 to vector<2x8x8xf32>
    %67 = arith.select %65, %63, %66 : vector<2x8x8xi1>, vector<2x8x8xf32>
    %cst_18 = arith.constant dense<0xFF800000> : vector<2x8xf32>
    %68 = vector.multi_reduction <maximumf>, %67, %cst_18 [2] : vector<2x8x8xf32> to vector<2x8xf32>
    %69 = vector.shape_cast %68 : vector<2x8xf32> to vector<2x8x1xf32>
    %70 = vector.broadcast %69 : vector<2x8x1xf32> to vector<2x8x8xf32>
    %71 = arith.subf %67, %70 : vector<2x8x8xf32>
    %72 = math.exp %71 : vector<2x8x8xf32>
    %cst_19 = arith.constant dense<0.000000e+00> : vector<2x8xf32>
    %73 = vector.multi_reduction <add>, %72, %cst_19 [2] : vector<2x8x8xf32> to vector<2x8xf32>
    %74 = vector.shape_cast %73 : vector<2x8xf32> to vector<2x8x1xf32>
    %75 = tpu.reciprocal %74 {approx = true} : vector<2x8x1xf32> -> vector<2x8x1xf32>
    %76 = vector.broadcast %75 : vector<2x8x1xf32> to vector<2x8x8xf32>
    %77 = arith.mulf %72, %76 : vector<2x8x8xf32>
    %78 = arith.truncf %77 : vector<2x8x8xf32> to vector<2x8x8xbf16>
    "tpu.trace_start"() <{level = 10 : i32, message = "bqk,bkd->bqd"}> : () -> ()
    %cst_20 = arith.constant dense<0.000000e+00> : vector<2x8x32xf32>
    %79 = tpu.matmul %78, %62, %cst_20 {dimension_numbers = #tpu.dot_dimension_numbers<[2], [1], [1], [2], [0, 0, 0, 1, 1, 2], [0], [0]>} : vector<2x8x8xbf16>, vector<2x8x32xbf16>, vector<2x8x32xf32> -> vector<2x8x32xf32>
    "tpu.trace_stop"() : () -> ()
    %80 = vector.extract_strided_slice %25 {offsets = [0, 0, 64], sizes = [2, 8, 32], strides = [1, 1, 1]} : vector<2x8x128xf32> to vector<2x8x32xf32>
    %81 = arith.truncf %80 : vector<2x8x32xf32> to vector<2x8x32xbf16>
    %82 = vector.extract_strided_slice %27 {offsets = [0, 0, 64], sizes = [2, 8, 32], strides = [1, 1, 1]} : vector<2x8x128xf32> to vector<2x8x32xf32>
    %83 = arith.truncf %82 : vector<2x8x32xf32> to vector<2x8x32xbf16>
    %84 = vector.extract_strided_slice %29 {offsets = [0, 0, 64], sizes = [2, 8, 32], strides = [1, 1, 1]} : vector<2x8x128xf32> to vector<2x8x32xf32>
    %85 = arith.truncf %84 : vector<2x8x32xf32> to vector<2x8x32xbf16>
    "tpu.trace_start"() <{level = 10 : i32, message = "bqd,bkd->bqk"}> : () -> ()
    %cst_21 = arith.constant dense<0.000000e+00> : vector<2x8x8xf32>
    %86 = tpu.matmul %81, %83, %cst_21 {dimension_numbers = #tpu.dot_dimension_numbers<[2], [2], [1], [1], [0, 0, 0, 1, 1, 1], [0], [0]>} : vector<2x8x32xbf16>, vector<2x8x32xbf16>, vector<2x8x8xf32> -> vector<2x8x8xf32>
    %cst_22 = arith.constant 0xFF800000 : f32
    "tpu.trace_stop"() : () -> ()
    %87 = vector.shape_cast %33 : vector<1x8x8xi1> to vector<1x8x8xi1>
    %88 = vector.broadcast %87 : vector<1x8x8xi1> to vector<2x8x8xi1>
    %89 = vector.broadcast %cst_22 : f32 to vector<2x8x8xf32>
    %90 = arith.select %88, %86, %89 : vector<2x8x8xi1>, vector<2x8x8xf32>
    %cst_23 = arith.constant dense<0xFF800000> : vector<2x8xf32>
    %91 = vector.multi_reduction <maximumf>, %90, %cst_23 [2] : vector<2x8x8xf32> to vector<2x8xf32>
    %92 = vector.shape_cast %91 : vector<2x8xf32> to vector<2x8x1xf32>
    %93 = vector.broadcast %92 : vector<2x8x1xf32> to vector<2x8x8xf32>
    %94 = arith.subf %90, %93 : vector<2x8x8xf32>
    %95 = math.exp %94 : vector<2x8x8xf32>
    %cst_24 = arith.constant dense<0.000000e+00> : vector<2x8xf32>
    %96 = vector.multi_reduction <add>, %95, %cst_24 [2] : vector<2x8x8xf32> to vector<2x8xf32>
    %97 = vector.shape_cast %96 : vector<2x8xf32> to vector<2x8x1xf32>
    %98 = tpu.reciprocal %97 {approx = true} : vector<2x8x1xf32> -> vector<2x8x1xf32>
    %99 = vector.broadcast %98 : vector<2x8x1xf32> to vector<2x8x8xf32>
    %100 = arith.mulf %95, %99 : vector<2x8x8xf32>
    %101 = arith.truncf %100 : vector<2x8x8xf32> to vector<2x8x8xbf16>
    "tpu.trace_start"() <{level = 10 : i32, message = "bqk,bkd->bqd"}> : () -> ()
    %cst_25 = arith.constant dense<0.000000e+00> : vector<2x8x32xf32>
    %102 = tpu.matmul %101, %85, %cst_25 {dimension_numbers = #tpu.dot_dimension_numbers<[2], [1], [1], [2], [0, 0, 0, 1, 1, 2], [0], [0]>} : vector<2x8x8xbf16>, vector<2x8x32xbf16>, vector<2x8x32xf32> -> vector<2x8x32xf32>
    "tpu.trace_stop"() : () -> ()
    %103 = vector.extract_strided_slice %25 {offsets = [0, 0, 96], sizes = [2, 8, 32], strides = [1, 1, 1]} : vector<2x8x128xf32> to vector<2x8x32xf32>
    %104 = arith.truncf %103 : vector<2x8x32xf32> to vector<2x8x32xbf16>
    %105 = vector.extract_strided_slice %27 {offsets = [0, 0, 96], sizes = [2, 8, 32], strides = [1, 1, 1]} : vector<2x8x128xf32> to vector<2x8x32xf32>
    %106 = arith.truncf %105 : vector<2x8x32xf32> to vector<2x8x32xbf16>
    %107 = vector.extract_strided_slice %29 {offsets = [0, 0, 96], sizes = [2, 8, 32], strides = [1, 1, 1]} : vector<2x8x128xf32> to vector<2x8x32xf32>
    %108 = arith.truncf %107 : vector<2x8x32xf32> to vector<2x8x32xbf16>
    "tpu.trace_start"() <{level = 10 : i32, message = "bqd,bkd->bqk"}> : () -> ()
    %cst_26 = arith.constant dense<0.000000e+00> : vector<2x8x8xf32>
    %109 = tpu.matmul %104, %106, %cst_26 {dimension_numbers = #tpu.dot_dimension_numbers<[2], [2], [1], [1], [0, 0, 0, 1, 1, 1], [0], [0]>} : vector<2x8x32xbf16>, vector<2x8x32xbf16>, vector<2x8x8xf32> -> vector<2x8x8xf32>
    %cst_27 = arith.constant 0xFF800000 : f32
    "tpu.trace_stop"() : () -> ()
    %110 = vector.shape_cast %33 : vector<1x8x8xi1> to vector<1x8x8xi1>
    %111 = vector.broadcast %110 : vector<1x8x8xi1> to vector<2x8x8xi1>
    %112 = vector.broadcast %cst_27 : f32 to vector<2x8x8xf32>
    %113 = arith.select %111, %109, %112 : vector<2x8x8xi1>, vector<2x8x8xf32>
    %cst_28 = arith.constant dense<0xFF800000> : vector<2x8xf32>
    %114 = vector.multi_reduction <maximumf>, %113, %cst_28 [2] : vector<2x8x8xf32> to vector<2x8xf32>
    %115 = vector.shape_cast %114 : vector<2x8xf32> to vector<2x8x1xf32>
    %116 = vector.broadcast %115 : vector<2x8x1xf32> to vector<2x8x8xf32>
    %117 = arith.subf %113, %116 : vector<2x8x8xf32>
    %118 = math.exp %117 : vector<2x8x8xf32>
    %cst_29 = arith.constant dense<0.000000e+00> : vector<2x8xf32>
    %119 = vector.multi_reduction <add>, %118, %cst_29 [2] : vector<2x8x8xf32> to vector<2x8xf32>
    %120 = vector.shape_cast %119 : vector<2x8xf32> to vector<2x8x1xf32>
    %121 = tpu.reciprocal %120 {approx = true} : vector<2x8x1xf32> -> vector<2x8x1xf32>
    %122 = vector.broadcast %121 : vector<2x8x1xf32> to vector<2x8x8xf32>
    %123 = arith.mulf %118, %122 : vector<2x8x8xf32>
    %124 = arith.truncf %123 : vector<2x8x8xf32> to vector<2x8x8xbf16>
    "tpu.trace_start"() <{level = 10 : i32, message = "bqk,bkd->bqd"}> : () -> ()
    %cst_30 = arith.constant dense<0.000000e+00> : vector<2x8x32xf32>
    %125 = tpu.matmul %124, %108, %cst_30 {dimension_numbers = #tpu.dot_dimension_numbers<[2], [1], [1], [2], [0, 0, 0, 1, 1, 2], [0], [0]>} : vector<2x8x8xbf16>, vector<2x8x32xbf16>, vector<2x8x32xf32> -> vector<2x8x32xf32>
    "tpu.trace_stop"() : () -> ()
    %126 = tpu.concatenate %56, %79, %102, %125 in 2 : vector<2x8x32xf32>, vector<2x8x32xf32>, vector<2x8x32xf32>, vector<2x8x32xf32> -> vector<2x8x128xf32>
    %127 = vector.shape_cast %126 : vector<2x8x128xf32> to vector<16x128xf32>
    %128 = arith.truncf %127 : vector<16x128xf32> to vector<16x128xbf16>
    %c0_31 = arith.constant 0 : index
    %c0_32 = arith.constant 0 : index
    %129 = vector.load %arg5[%c0_31, %c0_32] : memref<128x128xbf16, #tpu.memory_space<vmem>>, vector<128x128xbf16>
    %cst_33 = arith.constant dense<0.000000e+00> : vector<16x128xf32>
    %130 = tpu.matmul %128, %129, %cst_33 {dimension_numbers = #tpu.dot_dimension_numbers<[1], [0], [0], [1], [0, 0, 1, 1], [], []>} : vector<16x128xbf16>, vector<128x128xbf16>, vector<16x128xf32> -> vector<16x128xf32>
    %131 = arith.addf %1, %130 : vector<16x128xf32>
    %c0_34 = arith.constant 0 : index
    %c0_35 = arith.constant 0 : index
    %132 = vector.load %arg3[%c0_34, %c0_35] : memref<1x128xf32, #tpu.memory_space<vmem>>, vector<1x128xf32>
    %cst_36 = arith.constant dense<0.000000e+00> : vector<16xf32>
    %133 = vector.multi_reduction <add>, %131, %cst_36 [1] : vector<16x128xf32> to vector<16xf32>
    %134 = vector.shape_cast %133 : vector<16xf32> to vector<16x1xf32>
    %cst_37 = arith.constant 1.280000e+02 : f32
    %135 = vector.broadcast %cst_37 : f32 to vector<16x1xf32>
    %136 = arith.divf %134, %135 : vector<16x1xf32>
    %137 = vector.broadcast %136 : vector<16x1xf32> to vector<16x128xf32>
    %138 = arith.subf %131, %137 : vector<16x128xf32>
    %139 = arith.mulf %138, %138 : vector<16x128xf32>
    %cst_38 = arith.constant dense<0.000000e+00> : vector<16xf32>
    %140 = vector.multi_reduction <add>, %139, %cst_38 [1] : vector<16x128xf32> to vector<16xf32>
    %141 = vector.shape_cast %140 : vector<16xf32> to vector<16x1xf32>
    %cst_39 = arith.constant 1.280000e+02 : f32
    %142 = vector.broadcast %cst_39 : f32 to vector<16x1xf32>
    %143 = arith.divf %141, %142 : vector<16x1xf32>
    %cst_40 = arith.constant 9.99999974E-6 : f32
    %144 = vector.broadcast %cst_40 : f32 to vector<16x1xf32>
    %145 = arith.addf %143, %144 : vector<16x1xf32>
    %146 = math.rsqrt %145 : vector<16x1xf32>
    %147 = vector.broadcast %146 : vector<16x1xf32> to vector<16x128xf32>
    %148 = arith.mulf %138, %147 : vector<16x128xf32>
    %149 = vector.broadcast %132 : vector<1x128xf32> to vector<16x128xf32>
    %150 = arith.mulf %148, %149 : vector<16x128xf32>
    %151 = arith.truncf %150 : vector<16x128xf32> to vector<16x128xbf16>
    %c0_41 = arith.constant 0 : index
    %c0_42 = arith.constant 0 : index
    %152 = vector.load %arg6[%c0_41, %c0_42] : memref<128x512xbf16, #tpu.memory_space<vmem>>, vector<128x512xbf16>
    %cst_43 = arith.constant dense<0.000000e+00> : vector<16x512xf32>
    %153 = tpu.matmul %151, %152, %cst_43 {dimension_numbers = #tpu.dot_dimension_numbers<[1], [0], [0], [1], [0, 0, 1, 1], [], []>} : vector<16x128xbf16>, vector<128x512xbf16>, vector<16x512xf32> -> vector<16x512xf32>
    %cst_44 = arith.constant 5.000000e-01 : f32
    %154 = vector.broadcast %cst_44 : f32 to vector<16x512xf32>
    %155 = arith.mulf %154, %153 : vector<16x512xf32>
    %cst_45 = arith.constant 0.707106769 : f32
    %156 = vector.broadcast %cst_45 : f32 to vector<16x512xf32>
    %157 = arith.mulf %153, %156 : vector<16x512xf32>
    %158 = math.erf %157 : vector<16x512xf32>
    %cst_46 = arith.constant 1.000000e+00 : f32
    %159 = vector.broadcast %cst_46 : f32 to vector<16x512xf32>
    %160 = arith.addf %159, %158 : vector<16x512xf32>
    %161 = arith.mulf %155, %160 : vector<16x512xf32>
    %162 = arith.truncf %161 : vector<16x512xf32> to vector<16x512xbf16>
    %c0_47 = arith.constant 0 : index
    %c0_48 = arith.constant 0 : index
    %163 = vector.load %arg7[%c0_47, %c0_48] : memref<512x128xbf16, #tpu.memory_space<vmem>>, vector<512x128xbf16>
    %cst_49 = arith.constant dense<0.000000e+00> : vector<16x128xf32>
    %164 = tpu.matmul %162, %163, %cst_49 {dimension_numbers = #tpu.dot_dimension_numbers<[1], [0], [0], [1], [0, 0, 1, 1], [], []>} : vector<16x512xbf16>, vector<512x128xbf16>, vector<16x128xf32> -> vector<16x128xf32>
    %165 = arith.addf %131, %164 : vector<16x128xf32>
    %166 = vector.shape_cast %165 : vector<16x128xf32> to vector<2x8x128xf32>
    %c0_50 = arith.constant 0 : index
    %c0_51 = arith.constant 0 : index
    %c0_52 = arith.constant 0 : index
    %167 = vector.load %arg8[%c0_50, %c0_51, %c0_52] : memref<2x8x128xf32, #tpu.memory_space<vmem>>, vector<2x8x128xf32>
    tpu.vector_store %arg8[%c0_50, %c0_51, %c0_52], %166 {strides = array<i32>} : memref<2x8x128xf32, #tpu.memory_space<vmem>>, vector<2x8x128xf32>,
    return
  }
  func.func @transform_0(%arg0: i32) -> (i32, i32, i32) {
    %c0_i32 = arith.constant 0 : i32
    %c0_i32_0 = arith.constant 0 : i32
    %c0_i32_1 = arith.constant 0 : i32
    return %arg0, %c0_i32, %c0_i32_0 : i32, i32, i32
  }
  func.func @transform_1(%arg0: i32) -> (i32, i32) {
    %c0_i32 = arith.constant 0 : i32
    %c0_i32_0 = arith.constant 0 : i32
    %c0_i32_1 = arith.constant 0 : i32
    return %c0_i32, %c0_i32_0 : i32, i32
  }
  func.func @transform_2(%arg0: i32) -> (i32, i32) {
    %c0_i32 = arith.constant 0 : i32
    %c0_i32_0 = arith.constant 0 : i32
    %c0_i32_1 = arith.constant 0 : i32
    return %c0_i32, %c0_i32_0 : i32, i32
  }
  func.func @transform_3(%arg0: i32) -> (i32, i32) {
    %c0_i32 = arith.constant 0 : i32
    %c0_i32_0 = arith.constant 0 : i32
    %c0_i32_1 = arith.constant 0 : i32
    return %c0_i32, %c0_i32_0 : i32, i32
  }
  func.func @transform_4(%arg0: i32) -> (i32, i32) {
    %c0_i32 = arith.constant 0 : i32
    %c0_i32_0 = arith.constant 0 : i32
    %c0_i32_1 = arith.constant 0 : i32
    return %c0_i32, %c0_i32_0 : i32, i32
  }
  func.func @transform_5(%arg0: i32) -> (i32, i32) {
    %c0_i32 = arith.constant 0 : i32
    %c0_i32_0 = arith.constant 0 : i32
    %c0_i32_1 = arith.constant 0 : i32
    return %c0_i32, %c0_i32_0 : i32, i32
  }
  func.func @transform_6(%arg0: i32) -> (i32, i32) {
    %c0_i32 = arith.constant 0 : i32
    %c0_i32_0 = arith.constant 0 : i32
    %c0_i32_1 = arith.constant 0 : i32
    return %c0_i32, %c0_i32_0 : i32, i32
  }
  func.func @transform_7(%arg0: i32) -> (i32, i32, i32) {
    %c0_i32 = arith.constant 0 : i32
    %c0_i32_0 = arith.constant 0 : i32
    %c0_i32_1 = arith.constant 0 : i32
    return %arg0, %c0_i32, %c0_i32_0 : i32, i32, i32
  }
}

</mosaic_0001>

<bundles_post_ra>
// kernel: tpu_custom_call.1
= control target key start
LH: loop header
LB: loop body
LE: loop exit
PB: predicated region body
PF: predicated region fallthrough
CT: control target
= control target key end

     0   :  { %12 = vsyncpa [#allocation3], 0  ;;  %s3218_s0 = inlined_call_operand.hbm [shape: f32[2,8,128], index: 0, kind: input, shape index: {}]   ;;  %s3219_s1 = inlined_call_operand.vmem [shape: f32[1,128], index: 1, kind: input, shape index: {}]   ;;  %s3220_s2 = inlined_call_operand.vmem [shape: f32[1,128], index: 2, kind: input, shape index: {}]   ;;  %s3221_s3 = inlined_call_operand.hbm [shape: bf16[128,384], index: 3, kind: input, shape index: {}]   ;;  %s3222_s4 = inlined_call_operand.hbm [shape: bf16[128,128], index: 4, kind: input, shape index: {}]   ;;  %s3223_s5 = inlined_call_operand.hbm [shape: bf16[128,512], index: 5, kind: input, shape index: {}]   ;;  %s3224_s6 = inlined_call_operand.hbm [shape: bf16[512,128], index: 6, kind: input, shape index: {}]   ;;  %s3225_s7 = inlined_call_operand.hbm [shape: f32[2,8,128], index: 7, kind: output, shape index: {}]  }
   0x1   :  { %13 = vsyncpa [#allocation6], 0 }
   0x2   :  { %14 = vsyncpa [#allocation9], 0 }
   0x3   :  { %15 = vsyncpa [#allocation4], 0  ;;  %s2824_s24 = smov [#allocation5]   ;;  %s2684_s28 = scalar_lea.hbm %s3221_s3, 3072 }
   0x4   :  { %s37_s25 = sshll.u32 %s2824_s24, 4  ;;  %p2685_p0 = scmp.ne.s32.totalorder %s3221_s3, %s2684_s28  ;;  %s38_s25 = int_to_ptr.vmem [resolvable:$true] %s37_s25 }
   0x5   :  { %p2688_p1 = scmp.lt.u32.totalorder %s2684_s28, %s3221_s3 }
   0x7   :  { %p2690_p2 = pnand %p2688_p1, %p2685_p0 }
   0x9   :  { %2693 = shalt.err (!%p2690_p2)
}
   0xa   :  { %s2694_s10 = scalar_lea.vmem %s38_s25, 3072  ;;  %p2699_p4 = scmp.lt.s32.totalorder %s38_s25, %s38_s25 }
   0xb   :  { %p2695_p3 = scmp.ne.s32.totalorder %s38_s25, %s2694_s10  ;;  %p2700_p5 = scmp.lt.s32.totalorder %s2694_s10, %s2694_s10 }
   0xd   :  { %p2701_p6 = por %p2700_p5, %p2699_p4 }
   0xf   :  { %p2702_p7 = pnand %p2701_p6, %p2695_p3 }
  0x11   :  { %2705 = shalt.err (!%p2702_p7)
}
  0x12   :  { %s2825_s11 = smov 192   ;;  %s2826_s12 = smov 12  }
  0x13   :  { %43 = dma.hbm_to_vmem [thread:$0]  %s3221_s3, 3072, %s38_s25, [#allocation6], %s2825_s11, %s2825_s11, %s2826_s12  }
  0x14   :  { %s2827_s15 = smov [#allocation8]   ;;  %s2706_s19 = scalar_lea.hbm %s3223_s5, 4096 }
  0x15   :  { %s61_s16 = sshll.u32 %s2827_s15, 4  ;;  %p2707_p8 = scmp.ne.s32.totalorder %s3223_s5, %s2706_s19  ;;  %s62_s16 = int_to_ptr.vmem [resolvable:$true] %s61_s16 }
  0x16   :  { %p2710_p9 = scmp.lt.u32.totalorder %s2706_s19, %s3223_s5 }
  0x18   :  { %p2712_p10 = pnand %p2710_p9, %p2707_p8 }
  0x1a   :  { %2715 = shalt.err (!%p2712_p10)
}
  0x1b   :  { %s2716_s24 = scalar_lea.vmem %s62_s16, 4096  ;;  %p2721_p12 = scmp.lt.s32.totalorder %s62_s16, %s62_s16 }
  0x1c   :  { %p2717_p11 = scmp.ne.s32.totalorder %s62_s16, %s2716_s24  ;;  %p2722_p13 = scmp.lt.s32.totalorder %s2716_s24, %s2716_s24 }
  0x1e   :  { %p2723_p0 = por %p2722_p13, %p2721_p12 }
  0x20   :  { %p2724_p1 = pnand %p2723_p0, %p2717_p11 }
  0x22   :  { %2727 = shalt.err (!%p2724_p1)
}
  0x23   :  { %s2828_s3 = smov 256   ;;  %s2829_s25 = smov 16  }
  0x24   :  { %67 = dma.hbm_to_vmem [thread:$0]  %s3223_s5, 4096, %s62_s16, [#allocation9], %s2828_s3, %s2828_s3, %s2829_s25  }
  0x25   :  { %s2830_s28 = smov [#allocation2]   ;;  %s2728_s9 = scalar_lea.hbm %s3218_s0, 256 }
  0x26   :  { %s21_s29 = sshll.u32 %s2830_s28, 4  ;;  %p2729_p2 = scmp.ne.s32.totalorder %s3218_s0, %s2728_s9  ;;  %s22_s29 = int_to_ptr.vmem [resolvable:$true] %s21_s29 }
  0x27   :  { %p2732_p3 = scmp.lt.u32.totalorder %s2728_s9, %s3218_s0 }
  0x29   :  { %p2734_p4 = pnand %p2732_p3, %p2729_p2 }
  0x2b   :  { %2737 = shalt.err (!%p2734_p4)
}
  0x2c   :  { %s2738_s14 = scalar_lea.vmem %s22_s29, 256  ;;  %p2743_p6 = scmp.lt.s32.totalorder %s22_s29, %s22_s29 }
  0x2d   :  { %p2739_p5 = scmp.ne.s32.totalorder %s22_s29, %s2738_s14  ;;  %p2744_p7 = scmp.lt.s32.totalorder %s2738_s14, %s2738_s14 }
  0x2f   :  { %p2745_p8 = por %p2744_p7, %p2743_p6 }
  0x31   :  { %p2746_p9 = pnand %p2745_p8, %p2739_p5 }
  0x33   :  { %2749 = shalt.err (!%p2746_p9)
}
  0x34   :  { %s2831_s5 = smov 128   ;;  %s2832_s15 = smov 8  }
  0x35   :  { %27 = dma.hbm_to_vmem [thread:$0]  %s3218_s0, 256, %s22_s29, [#allocation3], %s2831_s5, %s2831_s5, %s2832_s15  }
  0x36   :  { %s2833_s18 = smov [#allocation7]   ;;  %s2750_s22 = scalar_lea.hbm %s3222_s4, 1024 }
  0x37   :  { %s49_s19 = sshll.u32 %s2833_s18, 4  ;;  %p2751_p10 = scmp.ne.s32.totalorder %s3222_s4, %s2750_s22  ;;  %s50_s19 = int_to_ptr.vmem [resolvable:$true] %s49_s19 }
  0x38   :  { %p2754_p11 = scmp.lt.u32.totalorder %s2750_s22, %s3222_s4 }
  0x3a   :  { %p2756_p12 = pnand %p2754_p11, %p2751_p10 }
  0x3c   :  { %2759 = shalt.err (!%p2756_p12)
}
  0x3d   :  { %s2760_s26 = scalar_lea.vmem %s50_s19, 1024  ;;  %p2765_p0 = scmp.lt.s32.totalorder %s50_s19, %s50_s19 }
  0x3e   :  { %p2761_p13 = scmp.ne.s32.totalorder %s50_s19, %s2760_s26  ;;  %p2766_p1 = scmp.lt.s32.totalorder %s2760_s26, %s2760_s26 }
  0x40   :  { %p2767_p2 = por %p2766_p1, %p2765_p0 }
  0x42   :  { %p2768_p3 = pnand %p2767_p2, %p2761_p13 }
  0x44   :  { %2771 = shalt.err (!%p2768_p3)
}
  0x45   :  { %s2834_s0 = smov 64   ;;  %s2835_s27 = smov 4  }
  0x46   :  { %55 = dma.hbm_to_vmem [thread:$0]  %s3222_s4, 1024, %s50_s19, [#allocation6], %s2834_s0, %s2834_s0, %s2835_s27  }
  0x47   :  { %s2836_s30 = smov [#allocation10]   ;;  %s2772_s11 = scalar_lea.hbm %s3224_s6, 4096 }
  0x48   :  { %s73_s8 = sshll.u32 %s2836_s30, 4  ;;  %p2773_p4 = scmp.ne.s32.totalorder %s3224_s6, %s2772_s11  ;;  %s74_s8 = int_to_ptr.vmem [resolvable:$true] %s73_s8 }
  0x49   :  { %p2776_p5 = scmp.lt.u32.totalorder %s2772_s11, %s3224_s6 }
  0x4b   :  { %p2778_p6 = pnand %p2776_p5, %p2773_p4 }
  0x4d   :  { %2781 = shalt.err (!%p2778_p6)
}
  0x4e   :  { %s2782_s17 = scalar_lea.vmem %s74_s8, 4096  ;;  %p2787_p8 = scmp.lt.s32.totalorder %s74_s8, %s74_s8 }
  0x4f   :  { %p2783_p7 = scmp.ne.s32.totalorder %s74_s8, %s2782_s17  ;;  %p2788_p9 = scmp.lt.s32.totalorder %s2782_s17, %s2782_s17 }
  0x51   :  { %p2789_p10 = por %p2788_p9, %p2787_p8 }
  0x53   :  { %p2790_p11 = pnand %p2789_p10, %p2783_p7 }
  0x55   :  { %2793 = shalt.err (!%p2790_p11)
}
  0x56   :  { %79 = dma.hbm_to_vmem [thread:$0]  %s3224_s6, 4096, %s74_s8, [#allocation9], %s2834_s0, %s2834_s0, %s2835_s27  }
  0x57   :  { %2816 = dma.done.wait [#allocation3], 256  }
  0x58   :  { %2817 = vsyncadd [#allocation3], 4294967040 }
  0x59   :  { %2818 = dma.done.wait [#allocation6], 4096  }
  0x5a   :  { %2819 = vsyncadd [#allocation6], 4294963200 }
  0x5b   :  { %2820 = dma.done.wait [#allocation9], 8192  }
  0x5c   :  { %2821 = vsyncadd [#allocation9], 4294959104  ;;  %v96_v0 = vld [vmem:[#allocation2] sm:$0xff]  ;;  %v97_v1 = vld [vmem:[#allocation2 + $0x8] sm:$0xff]  ;;  %v2837_v4 = vmov 0.0   ;;  %v2838_v30 = vmov 0  }
  0x5d   :  { %99 = vadd.xlane.f32.xlu0 %v96_v0  ;;  %v2506_v2 = vld [vmem:[#allocation5 + $0x4] ss:$12 sps:$4 sm:$0xff]   ;;  %v2508_v3 = vld [vmem:[#allocation5] ss:$12 sps:$4 sm:$0xff]   ;;  %2336 = vmatprep.subr.bf16.mxu1 %v2837_v4  ;;  %v2509_v5 = vld [vmem:[#allocation5 + $0x8] ss:$12 sps:$4 sm:$0xff]  }
  0x5e   :  { %v2510_v6 = vld [vmem:[#allocation5 + $0x1c] ss:$12 sps:$4 sm:$0xff]   ;;  %v2512_v7 = vld [vmem:[#allocation5 + $0x18] ss:$12 sps:$4 sm:$0xff]   ;;  %291 = vmatprep.subr.bf16.mxu0 %v2506_v2  ;;  %v2513_v8 = vld [vmem:[#allocation5 + $0x20] ss:$12 sps:$4 sm:$0xff]   ;;  %2337 = vmatpush3.bf16.msra.mxu1 %v2509_v5  ;;  %v375_v2 = vlaneseq }
  0x5f   :  { %292 = vmatpush1.bf16.msra.mxu0 %v2508_v3  ;;  %2338 = vmatprep.subr.bf16.mxu1 %v2837_v4  ;;  %v2514_v17 = vld [vmem:[#allocation5 + $0x34] ss:$12 sps:$4 sm:$0xff]   ;;  %v2516_v18 = vld [vmem:[#allocation5 + $0x30] ss:$12 sps:$4 sm:$0xff]   ;;  %v2517_v19 = vld [vmem:[#allocation5 + $0x38] ss:$12 sps:$4 sm:$0xff]  }
  0x60   :  { %293 = vmatprep.subr.bf16.mxu0 %v2510_v6  ;;  %v2518_v20 = vld [vmem:[#allocation5 + $0x4c] ss:$12 sps:$4 sm:$0xff]   ;;  %v2520_v21 = vld [vmem:[#allocation5 + $0x48] ss:$12 sps:$4 sm:$0xff]   ;;  %v2521_v22 = vld [vmem:[#allocation5 + $0x50] ss:$12 sps:$4 sm:$0xff]   ;;  %323 = vmatprep.mubr.bf16.mxu0 %v2838_v30 }
  0x61   :  { %101 = vadd.xlane.f32.xlu0 %v97_v1  ;;  %v2522_v23 = vld [vmem:[#allocation5 + $0x64] ss:$12 sps:$4 sm:$0xff]   ;;  %v2524_v24 = vld [vmem:[#allocation5 + $0x60] ss:$12 sps:$4 sm:$0xff]   ;;  %v2525_v25 = vld [vmem:[#allocation5 + $0x68] ss:$12 sps:$4 sm:$0xff]  }
  0x62   :  { %2339 = vmatpush3.bf16.msra.mxu1 %v2513_v8  ;;  %v2526_v26 = vld [vmem:[#allocation5 + $0x7c] ss:$12 sps:$4 sm:$0xff]   ;;  %v2528_v27 = vld [vmem:[#allocation5 + $0x78] ss:$12 sps:$4 sm:$0xff]   ;;  %v2529_v28 = vld [vmem:[#allocation5 + $0x80] ss:$12 sps:$4 sm:$0xff]  }
  0x63   :  { %294 = vmatpush1.bf16.msra.mxu0 %v2512_v7  ;;  %2340 = vmatprep.subr.bf16.mxu1 %v2837_v4  ;;  %v2530_v29 = vld [vmem:[#allocation5 + $0x94] ss:$12 sps:$4 sm:$0xff]   ;;  %vm2839_vm0 = vmmov 0   ;;  %v2532_v31 = vld [vmem:[#allocation5 + $0x90] ss:$12 sps:$4 sm:$0xff]   ;;  %vm386_vm1 = vcmask 261120  }
  0x64   :  { %295 = vmatprep.subr.bf16.mxu0 %v2514_v17  ;;  %2352 = vmatprep.mubr.msk.bf16.mxu1 %vm2839_vm0, %v2837_v4  ;;  %v2533_v32 = vld [vmem:[#allocation5 + $0x98] ss:$12 sps:$4 sm:$0xff]   ;;  %v2536_v34 = vld [vmem:[#allocation5 + $0xa8] ss:$12 sps:$4 sm:$0xff]   ;;  %v2537_v35 = vld [vmem:[#allocation5 + $0xb0] ss:$12 sps:$4 sm:$0xff]  }
  0x65   :  { %v2534_v33 = vld [vmem:[#allocation5 + $0xac] ss:$12 sps:$4 sm:$0xff]   ;;  %v2128_v45 = vld [vmem:[%s3219_s1] ss:$0 sm:$0xff]  ;;  %vm511_vm2 = vcmask 1043456   ;;  %v376_v3 = vshrl.u32 %v375_v2, 7 }
  0x66   :  { %2341 = vmatpush3.bf16.msra.mxu1 %v2517_v19  ;;  %v378_v5 = vand.u32 127, %v375_v2  ;;  %vm483_vm4 = vcmask 64512   ;;  %s2840_s1 = smov 96   ;;  %s2841_s20 = smov 32   ;;  %vm1299_vm5 = vcmask 523264   ;;  %vm1302_vm6 = vcmask 785408  }
  0x67   :  { %296 = vmatpush1.bf16.msra.mxu0 %v2516_v18  ;;  %2342 = vmatprep.subr.bf16.mxu1 %v2837_v4 }
  0x68   :  { %297 = vmatprep.subr.bf16.mxu0 %v2518_v20  ;;  %vm3009_vm3 = vcmp.ge.s32.totalorder %v376_v3, %v378_v5 }
  0x6a   :  { %2343 = vmatpush3.bf16.msra.mxu1 %v2521_v22 }
  0x6b   :  { %298 = vmatpush1.bf16.msra.mxu0 %v2520_v21  ;;  %2344 = vmatprep.subr.bf16.mxu1 %v2837_v4 }
  0x6c   :  { %299 = vmatprep.subr.bf16.mxu0 %v2522_v23 }
  0x6e   :  { %2345 = vmatpush3.bf16.msra.mxu1 %v2525_v25 }
  0x6f   :  { %300 = vmatpush1.bf16.msra.mxu0 %v2524_v24  ;;  %2346 = vmatprep.subr.bf16.mxu1 %v2837_v4 }
  0x70   :  { %301 = vmatprep.subr.bf16.mxu0 %v2526_v26 }
  0x72   :  { %2347 = vmatpush3.bf16.msra.mxu1 %v2529_v28 }
  0x73   :  { %302 = vmatpush1.bf16.msra.mxu0 %v2528_v27  ;;  %2348 = vmatprep.subr.bf16.mxu1 %v2837_v4 }
  0x74   :  { %303 = vmatprep.subr.bf16.mxu0 %v2530_v29 }
  0x76   :  { %2349 = vmatpush3.bf16.msra.mxu1 %v2533_v32 }
  0x77   :  { %304 = vmatpush1.bf16.msra.mxu0 %v2532_v31  ;;  %2350 = vmatprep.subr.bf16.mxu1 %v2837_v4 }
  0x78   :  { %305 = vmatprep.subr.bf16.mxu0 %v2534_v33 }
  0x7a   :  { %2351 = vmatpush3.bf16.msra.mxu1 %v2537_v35 }
  0x7b   :  { %306 = vmatpush1.bf16.msra.mxu0 %v2536_v34  ;;  %2356 = vmatprep.subr.bf16.mxu1 %v2837_v4 }
  0x7c   :  { %2380 = vmatprep.subr.bf16.mxu0 %v2837_v4 }
  0xea   :  { %v100_v9 = vpop.xlane.xlu0 %99 }
  0xeb   :  { %v104_v10 = vmul.f32 0.0078125, %v100_v9 }
  0xed   :  { %v2953_v11 = vsub.f32 %v96_v0, %v104_v10 }
  0xee   :  { %v102_v12 = vpop.xlane.xlu0 %101 }
  0xef   :  { %v105_v13 = vmul.f32 0.0078125, %v102_v12  ;;  %v108_v14 = vmul.f32 %v2953_v11, %v2953_v11 }
  0xf1   :  { %v2957_v15 = vsub.f32 %v97_v1, %v105_v13  ;;  %110 = vadd.xlane.f32.xlu1 %v108_v14 }
  0xf3   :  { %v109_v16 = vmul.f32 %v2957_v15, %v2957_v15 }
  0xf5   :  { %112 = vadd.xlane.f32.xlu1 %v109_v16 }
 0x17e   :  { %v111_v36 = vpop.xlane.xlu1 %110 }
 0x17f   :  { %v114_v37 = vmul.f32 0.0078125, %v111_v36 }
 0x181   :  { %v116_v38 = vadd.f32 1e-05, %v114_v37 }
 0x182   :  { %v113_v39 = vpop.xlane.xlu1 %112 }
 0x183   :  { %2626 = vrsqrt.f32 %v116_v38  ;;  %v115_v40 = vmul.f32 0.0078125, %v113_v39 }
 0x185   :  { %v117_v41 = vadd.f32 1e-05, %v115_v40 }
 0x187   :  { %2628 = vrsqrt.f32 %v117_v41 }
 0x18d   :  { %v2627_v42 = vpop.eup %2626 }
 0x18e   :  { %v120_v43 = vmul.f32 %v2627_v42, %v2953_v11 }
 0x190   :  { %v128_v47 = vmul.f32 %v2128_v45, %v120_v43 }
 0x191   :  { %v2629_v44 = vpop.eup %2628 }
 0x192   :  { %v121_v46 = vmul.f32 %v2629_v44, %v2957_v15 }
 0x194   :  { %v129_v48 = vmul.f32 %v2128_v45, %v121_v46 }
 0x196   :  { %v130_v49 = vpack.c.bf16 %v129_v48, %v128_v47 }
 0x198   :  { %324 = vmatmul.mubr.bf16.vlgmr.msra.gmra.mrb[0].mxu0 %v130_v49  ;;  %2353 = vmatmul.mubr.bf16.vlgmr.msra.gmra.mrb[0].mxu1 %v130_v49 }
 0x199   :  { %2358 = vmatprep.mubr.msk.bf16.mxu1 %vm2839_vm0, %v2837_v4  ;;  %2382 = vmatprep.mubr.msk.bf16.mxu0 %vm2839_vm0, %v2837_v4 }
 0x26b   :  { %v325_v50 = vpop.f32.mrb[0].mxu0  ;;  %v368_v51 = vpop.f32.mrb[0].mxu1 }
 0x26c   :  { %v327_v52 = vpop.f32.mrb[1].mxu0  ;;  %v2354_v53 = vpop.f32.mrb[1].mxu1  ;;  %v2989_v61 = vpack.c.bf16 %v325_v50, %v325_v50  ;;  %v2998_v63 = vpack.c.bf16 %v368_v51, %v368_v51 }
 0x26d   :  { %v2980_v54 = vpack.c.bf16 %v327_v52, %v327_v52  ;;  %v329_v55 = vpop.f32.mrb[2].mxu0  ;;  %v2982_v56 = vpop.f32.mrb[2].mxu1 }
 0x26e   :  { %v331_v57 = vpop.f32.mrb[3].mxu0  ;;  %v2355_v58 = vpop.f32.mrb[3].mxu1  ;;  %v3000_v0 = vpack.c.bf16 %v329_v55, %v329_v55  ;;  %v513_v1 = vsel %vm511_vm2, %v2998_v63, 0  ;;  %v3033_v36 = vpack.c.bf16 %v2982_v56, %v2982_v56 }
 0x26f   :  { %v391_v59 = vsel %vm386_vm1, %v2980_v54, 0  ;;  %v2987_v60 = vpack.c.bf16 %v331_v57, %v331_v57 }
 0x270   :  { %2357 = vmatpush3.bf16.xpose.msra.mxu1 %v391_v59  ;;  %v559_v40 = vsel %vm511_vm2, %v3033_v36, 0 }
 0x271   :  { %2362 = vmatprep.subr.bf16.mxu1 %v2837_v4  ;;  %v437_v62 = vsel %vm386_vm1, %v2987_v60, 0 }
 0x277   :  { %2359 = vmatmul.mubr.msk.bf16.vlgmr.msra.gmra.mrb[4].mxu1 %vm386_vm1, %v2989_v61 }
 0x278   :  { %2363 = vmatpush3.bf16.xpose.msra.mxu1 %v437_v62  ;;  %2364 = vmatprep.mubr.msk.bf16.mxu1 %vm2839_vm0, %v2837_v4 }
 0x279   :  { %2368 = vmatprep.subr.bf16.mxu1 %v2837_v4 }
 0x27f   :  { %2365 = vmatmul.mubr.msk.bf16.vlgmr.msra.gmra.mrb[8].mxu1 %vm386_vm1, %v3000_v0 }
 0x280   :  { %2369 = vmatpush3.bf16.msra.mxu1 %v513_v1  ;;  %2370 = vmatprep.mubr.msk.bf16.mxu1 %vm2839_vm0, %v2837_v4 }
 0x281   :  { %2374 = vmatprep.subr.bf16.mxu1 %v2837_v4 }
 0x34a   :  { %v427_v7 = vpop.f32.mrb[4].mxu1 }
 0x34b   :  { %v481_v8 = vsel %vm3009_vm3, %v427_v7, -inf  ;;  %v2360_v9 = vpop.f32.mrb[5].mxu1 }
 0x34c   :  { %v430_v10 = vpop.f32.mrb[6].mxu1  ;;  %v484_v11 = vsel %vm483_vm4, %v481_v8, -inf }
 0x34d   :  { %485 = vmax.xlane.f32.xlu0 %v484_v11  ;;  %v2361_v12 = vpop.f32.mrb[7].mxu1 }
 0x352   :  { %v473_v13 = vpop.f32.mrb[8].mxu1 }
 0x353   :  { %v482_v14 = vsel %vm3009_vm3, %v473_v13, -inf  ;;  %v2366_v15 = vpop.f32.mrb[9].mxu1 }
 0x354   :  { %v476_v16 = vpop.f32.mrb[10].mxu1  ;;  %v487_v17 = vsel %vm483_vm4, %v482_v14, -inf }
 0x355   :  { %488 = vmax.xlane.f32.xlu1 %v487_v17  ;;  %v2367_v18 = vpop.f32.mrb[11].mxu1 }
 0x366   :  { %657 = vrot.lane.b32.xlu1 %v2987_v60, %s2840_s1 }
 0x3da   :  { %v486_v19 = vpop.xlane.xlu0 %485 }
 0x3db   :  { %v490_v20 = vsub.f32 %v481_v8, %v486_v19 }
 0x3dd   :  { %v492_v21 = vmul.f32 1.442695, %v490_v20 }
 0x3df   :  { %2630 = vpow2.f32 %v492_v21 }
 0x3e2   :  { %v489_v22 = vpop.xlane.xlu1 %488 }
 0x3e3   :  { %v491_v23 = vsub.f32 %v482_v14, %v489_v22 }
 0x3e5   :  { %v494_v24 = vmul.f32 1.442695, %v491_v23 }
 0x3e6   :  { %v658_v31 = vpop.permute.xlu1 %657 }
 0x3e7   :  { %2632 = vpow2.f32 %v494_v24  ;;  %v663_v44 = vsel %vm386_vm1, %v658_v31, 0 }
 0x3e9   :  { %v2631_v25 = vpop.eup %2630 }
 0x3ea   :  { %v496_v26 = vsel %vm483_vm4, %v2631_v25, 0.0 }
 0x3eb   :  { %497 = vadd.xlane.f32.xlu0 %v496_v26 }
 0x3f1   :  { %v2633_v27 = vpop.eup %2632 }
 0x3f2   :  { %v499_v28 = vsel %vm483_vm4, %v2633_v27, 0.0 }
 0x3f3   :  { %500 = vadd.xlane.f32.xlu1 %v499_v28 }
 0x401   :  { %605 = vrot.lane.b32.xlu0 %v2980_v54, %s2840_s1 }
 0x404   :  { %602 = vrot.lane.b32.xlu1 %v2989_v61, %s2840_s1 }
 0x408   :  { %654 = vrot.lane.b32.xlu1 %v3000_v0, %s2840_s1 }
 0x478   :  { %v498_v29 = vpop.xlane.xlu0 %497 }
 0x479   :  { %2634 = vrcp.f32 %v498_v29 }
 0x47c   :  { %v606_v32 = vpop.permute.xlu0 %605 }
 0x47d   :  { %v611_v33 = vsel %vm386_vm1, %v606_v32, 0 }
 0x47e   :  { %2381 = vmatpush3.bf16.xpose.msra.mxu0 %v611_v33 }
 0x47f   :  { %2392 = vmatprep.subr.bf16.mxu0 %v2837_v4 }
 0x480   :  { %v501_v34 = vpop.xlane.xlu1 %500 }
 0x481   :  { %2636 = vrcp.f32 %v501_v34 }
 0x483   :  { %v2635_v35 = vpop.eup %2634 }
 0x484   :  { %v504_v37 = vmul.f32 %v2635_v35, %v2631_v25  ;;  %v603_v38 = vpop.permute.xlu1 %602 }
 0x485   :  { %2383 = vmatmul.mubr.msk.bf16.vlgmr.msra.gmra.mrb[4].mxu0 %vm386_vm1, %v603_v38 }
 0x486   :  { %v506_v39 = vpack.c.bf16 %v504_v37, %v504_v37  ;;  %2394 = vmatprep.mubr.msk.bf16.mxu0 %vm2839_vm0, %v2837_v4 }
 0x488   :  { %2371 = vmatmul.mubr.msk.bf16.vlgmr.msra.gmra.mrb[12].mxu1 %vm483_vm4, %v506_v39  ;;  %v655_v45 = vpop.permute.xlu1 %654 }
 0x489   :  { %2375 = vmatpush3.bf16.msra.mxu1 %v559_v40  ;;  %2376 = vmatprep.mubr.msk.bf16.mxu1 %vm2839_vm0, %v2837_v4 }
 0x48a   :  { %2386 = vmatprep.subr.bf16.mxu1 %v2837_v4 }
 0x48b   :  { %v2637_v41 = vpop.eup %2636 }
 0x48c   :  { %v505_v42 = vmul.f32 %v2637_v41, %v2633_v27 }
 0x48e   :  { %v507_v43 = vpack.c.bf16 %v505_v42, %v505_v42 }
 0x490   :  { %2377 = vmatmul.mubr.msk.bf16.vlgmr.msra.gmra.mrb[16].mxu1 %vm483_vm4, %v507_v43 }
 0x491   :  { %2388 = vmatprep.mubr.msk.bf16.mxu1 %vm2839_vm0, %v2837_v4 }
 0x492   :  { %2387 = vmatpush3.bf16.xpose.msra.mxu1 %v663_v44 }
 0x493   :  { %2398 = vmatprep.subr.bf16.mxu1 %v2837_v4 }
 0x499   :  { %2389 = vmatmul.mubr.msk.bf16.vlgmr.msra.gmra.mrb[20].mxu1 %vm386_vm1, %v655_v45 }
 0x49a   :  { %2400 = vmatprep.mubr.msk.bf16.mxu1 %vm2839_vm0, %v2837_v4 }
 0x558   :  { %v647_v46 = vpop.f32.mrb[4].mxu0 }
 0x559   :  { %v705_v47 = vsel %vm3009_vm3, %v647_v46, -inf  ;;  %v2384_v48 = vpop.f32.mrb[5].mxu0 }
 0x55a   :  { %v650_v49 = vpop.f32.mrb[6].mxu0  ;;  %v707_v50 = vsel %vm483_vm4, %v705_v47, -inf }
 0x55b   :  { %708 = vmax.xlane.f32.xlu0 %v707_v50  ;;  %v3055_v51 = vpop.f32.mrb[12].mxu1  ;;  %v2385_v52 = vpop.f32.mrb[7].mxu0 }
 0x55c   :  { %v2372_v53 = vpop.f32.mrb[13].mxu1 }
 0x55d   :  { %v552_v55 = vpop.f32.mrb[14].mxu1 }
 0x55e   :  { %v2373_v56 = vpop.f32.mrb[15].mxu1 }
 0x563   :  { %v3057_v57 = vpop.f32.mrb[16].mxu1 }
 0x564   :  { %v2378_v58 = vpop.f32.mrb[17].mxu1 }
 0x565   :  { %v598_v59 = vpop.f32.mrb[18].mxu1 }
 0x566   :  { %v2379_v62 = vpop.f32.mrb[19].mxu1 }
 0x56c   :  { %v699_v1 = vpop.f32.mrb[20].mxu1 }
 0x56d   :  { %v706_v2 = vsel %vm3009_vm3, %v699_v1, -inf  ;;  %v2390_v3 = vpop.f32.mrb[21].mxu1 }
 0x56e   :  { %v702_v5 = vpop.f32.mrb[22].mxu1  ;;  %v710_v7 = vsel %vm483_vm4, %v706_v2, -inf }
 0x56f   :  { %711 = vmax.xlane.f32.xlu1 %v710_v7  ;;  %v2391_v8 = vpop.f32.mrb[23].mxu1 }
 0x580   :  { %781 = vrot.lane.b32.xlu1 %v3033_v36, %s2840_s1 }
 0x584   :  { %831 = vrot.lane.b32.xlu1 %v2980_v54, %s2834_s0 }
 0x588   :  { %881 = vrot.lane.b32.xlu1 %v2987_v60, %s2834_s0 }
 0x58c   :  { %879 = vrot.lane.b32.xlu1 %v3000_v0, %s2834_s0 }
 0x5e8   :  { %v709_v9 = vpop.xlane.xlu0 %708 }
 0x5e9   :  { %v713_v10 = vsub.f32 %v705_v47, %v709_v9 }
 0x5eb   :  { %v715_v11 = vmul.f32 1.442695, %v713_v10 }
 0x5ed   :  { %2638 = vpow2.f32 %v715_v11 }
 0x5f7   :  { %v2639_v12 = vpop.eup %2638 }
 0x5f8   :  { %v719_v13 = vsel %vm483_vm4, %v2639_v12, 0.0 }
 0x5f9   :  { %720 = vadd.xlane.f32.xlu0 %v719_v13 }
 0x5fc   :  { %v712_v14 = vpop.xlane.xlu1 %711 }
 0x5fd   :  { %v714_v15 = vsub.f32 %v706_v2, %v712_v14 }
 0x5ff   :  { %v717_v16 = vmul.f32 1.442695, %v714_v15 }
 0x600   :  { %v782_v17 = vpop.permute.xlu1 %781 }
 0x601   :  { %2640 = vpow2.f32 %v717_v16  ;;  %v787_v18 = vsel %vm511_vm2, %v782_v17, 0 }
 0x602   :  { %2399 = vmatpush3.bf16.msra.mxu1 %v787_v18 }
 0x603   :  { %2410 = vmatprep.subr.bf16.mxu1 %v2837_v4 }
 0x604   :  { %v832_v27 = vpop.permute.xlu1 %831 }
 0x605   :  { %v837_v33 = vsel %vm386_vm1, %v832_v27, 0 }
 0x608   :  { %v882_v32 = vpop.permute.xlu1 %881 }
 0x609   :  { %v887_v35 = vsel %vm386_vm1, %v882_v32, 0 }
 0x60b   :  { %v2641_v19 = vpop.eup %2640 }
 0x60c   :  { %v722_v20 = vsel %vm483_vm4, %v2641_v19, 0.0  ;;  %v880_v38 = vpop.permute.xlu1 %879 }
 0x60d   :  { %723 = vadd.xlane.f32.xlu0 %v722_v20 }
 0x623   :  { %732 = vrot.lane.b32.xlu0 %v2998_v63, %s2840_s1 }
 0x627   :  { %829 = vrot.lane.b32.xlu0 %v2989_v61, %s2834_s0 }
 0x686   :  { %v721_v21 = vpop.xlane.xlu0 %720 }
 0x687   :  { %2642 = vrcp.f32 %v721_v21 }
 0x691   :  { %v2643_v22 = vpop.eup %2642 }
 0x692   :  { %v727_v24 = vmul.f32 %v2643_v22, %v2639_v12 }
 0x694   :  { %v729_v28 = vpack.c.bf16 %v727_v24, %v727_v24 }
 0x69a   :  { %v724_v23 = vpop.xlane.xlu0 %723 }
 0x69b   :  { %2644 = vrcp.f32 %v724_v23 }
 0x69e   :  { %v733_v25 = vpop.permute.xlu0 %732 }
 0x69f   :  { %v738_v26 = vsel %vm511_vm2, %v733_v25, 0 }
 0x6a0   :  { %2393 = vmatpush3.bf16.msra.mxu0 %v738_v26 }
 0x6a1   :  { %2404 = vmatprep.subr.bf16.mxu0 %v2837_v4 }
 0x6a2   :  { %v830_v37 = vpop.permute.xlu0 %829 }
 0x6a3   :  { %2395 = vmatmul.mubr.msk.bf16.vlgmr.msra.gmra.mrb[8].mxu0 %vm483_vm4, %v729_v28 }
 0x6a4   :  { %2406 = vmatprep.mubr.msk.bf16.mxu0 %vm2839_vm0, %v2837_v4 }
 0x6a5   :  { %v2645_v29 = vpop.eup %2644 }
 0x6a6   :  { %v728_v31 = vmul.f32 %v2645_v29, %v2641_v19 }
 0x6a8   :  { %v730_v34 = vpack.c.bf16 %v728_v31, %v728_v31 }
 0x6a9   :  { %2405 = vmatpush3.bf16.xpose.msra.mxu0 %v837_v33 }
 0x6aa   :  { %2401 = vmatmul.mubr.msk.bf16.vlgmr.msra.gmra.mrb[24].mxu1 %vm483_vm4, %v730_v34  ;;  %2416 = vmatprep.subr.bf16.mxu0 %v2837_v4 }
 0x6ab   :  { %2411 = vmatpush3.bf16.xpose.msra.mxu1 %v887_v35  ;;  %2412 = vmatprep.mubr.msk.bf16.mxu1 %vm2839_vm0, %v2837_v4 }
 0x6ac   :  { %2422 = vmatprep.subr.bf16.mxu1 %v2837_v4 }
 0x6b0   :  { %2407 = vmatmul.mubr.msk.bf16.vlgmr.msra.gmra.mrb[12].mxu0 %vm386_vm1, %v830_v37 }
 0x6b1   :  { %2418 = vmatprep.mubr.msk.bf16.mxu0 %vm2839_vm0, %v2837_v4 }
 0x6b2   :  { %2413 = vmatmul.mubr.msk.bf16.vlgmr.msra.gmra.mrb[28].mxu1 %vm386_vm1, %v880_v38 }
 0x6b3   :  { %2424 = vmatprep.mubr.msk.bf16.mxu1 %vm2839_vm0, %v2837_v4 }
 0x776   :  { %v3096_v39 = vpop.f32.mrb[8].mxu0 }
 0x777   :  { %v2396_v40 = vpop.f32.mrb[9].mxu0 }
 0x778   :  { %v777_v41 = vpop.f32.mrb[10].mxu0 }
 0x779   :  { %v2397_v42 = vpop.f32.mrb[11].mxu0 }
 0x77d   :  { %v3098_v43 = vpop.f32.mrb[24].mxu1 }
 0x77e   :  { %v2491_v44 = vpack.i.bf16 %v3098_v43, %v3096_v39  ;;  %v2402_v45 = vpop.f32.mrb[25].mxu1 }
 0x77f   :  { %v826_v46 = vpop.f32.mrb[26].mxu1 }
 0x780   :  { %v2403_v47 = vpop.f32.mrb[27].mxu1 }
 0x783   :  { %v873_v48 = vpop.f32.mrb[12].mxu0 }
 0x784   :  { %v929_v49 = vsel %vm3009_vm3, %v873_v48, -inf  ;;  %v2408_v50 = vpop.f32.mrb[13].mxu0 }
 0x785   :  { %v876_v52 = vpop.f32.mrb[14].mxu0  ;;  %v923_v53 = vpop.f32.mrb[28].mxu1  ;;  %v931_v55 = vsel %vm483_vm4, %v929_v49, -inf }
 0x786   :  { %v930_v56 = vsel %vm3009_vm3, %v923_v53, -inf  ;;  %932 = vmax.xlane.f32.xlu0 %v931_v55  ;;  %v2409_v58 = vpop.f32.mrb[15].mxu0  ;;  %v2414_v59 = vpop.f32.mrb[29].mxu1 }
 0x787   :  { %v926_v62 = vpop.f32.mrb[30].mxu1  ;;  %v934_v1 = vsel %vm483_vm4, %v930_v56, -inf }
 0x788   :  { %935 = vmax.xlane.f32.xlu1 %v934_v1  ;;  %v2415_v2 = vpop.f32.mrb[31].mxu1 }
 0x799   :  { %1003 = vrot.lane.b32.xlu1 %v3033_v36, %s2834_s0 }
 0x79d   :  { %1053 = vrot.lane.b32.xlu1 %v2980_v54, %s2841_s20 }
 0x7a1   :  { %1103 = vrot.lane.b32.xlu1 %v2987_v60, %s2841_s20 }
 0x7a5   :  { %1101 = vrot.lane.b32.xlu1 %v3000_v0, %s2841_s20 }
 0x813   :  { %v933_v3 = vpop.xlane.xlu0 %932 }
 0x814   :  { %v937_v5 = vsub.f32 %v929_v49, %v933_v3 }
 0x815   :  { %v936_v7 = vpop.xlane.xlu1 %935 }
 0x816   :  { %v939_v8 = vmul.f32 1.442695, %v937_v5  ;;  %v938_v9 = vsub.f32 %v930_v56, %v936_v7 }
 0x818   :  { %2646 = vpow2.f32 %v939_v8  ;;  %v941_v10 = vmul.f32 1.442695, %v938_v9 }
 0x819   :  { %v1004_v11 = vpop.permute.xlu1 %1003 }
 0x81a   :  { %2648 = vpow2.f32 %v941_v10  ;;  %v1009_v12 = vsel %vm511_vm2, %v1004_v11, 0 }
 0x81b   :  { %2423 = vmatpush3.bf16.msra.mxu1 %v1009_v12 }
 0x81c   :  { %2434 = vmatprep.subr.bf16.mxu1 %v2837_v4 }
 0x81d   :  { %v1054_v19 = vpop.permute.xlu1 %1053 }
 0x821   :  { %v1104_v24 = vpop.permute.xlu1 %1103 }
 0x822   :  { %v2647_v54 = vpop.eup %2646  ;;  %v1109_v26 = vsel %vm386_vm1, %v1104_v24, 0 }
 0x823   :  { %v943_v60 = vsel %vm483_vm4, %v2647_v54, 0.0 }
 0x824   :  { %v2649_v13 = vpop.eup %2648  ;;  %944 = vadd.xlane.f32.xlu0 %v943_v60 }
 0x825   :  { %v946_v0 = vsel %vm483_vm4, %v2649_v13, 0.0  ;;  %v1102_v28 = vpop.permute.xlu1 %1101 }
 0x828   :  { %947 = vadd.xlane.f32.xlu0 %v946_v0  ;;  %v2538_v0 = vld [vmem:[#allocation7] sm:$0xff]  }
 0x83e   :  { %955 = vrot.lane.b32.xlu0 %v2998_v63, %s2834_s0 }
 0x842   :  { %1051 = vrot.lane.b32.xlu0 %v2989_v61, %s2841_s20  ;;  %v1059_v61 = vsel %vm386_vm1, %v1054_v19, 0  ;;  %v2544_v19 = vld [vmem:[#allocation7 + $0x30] sm:$0xff]  }
 0x8b1   :  { %v945_v14 = vpop.xlane.xlu0 %944 }
 0x8b2   :  { %2650 = vrcp.f32 %v945_v14  ;;  %v2539_v14 = vld [vmem:[#allocation7 + $0x8] sm:$0xff]  }
 0x8b5   :  { %v948_v15 = vpop.xlane.xlu0 %947 }
 0x8b6   :  { %2652 = vrcp.f32 %v948_v15  ;;  %v2540_v15 = vld [vmem:[#allocation7 + $0x10] sm:$0xff]  }
 0x8b9   :  { %v956_v16 = vpop.permute.xlu0 %955 }
 0x8ba   :  { %v961_v17 = vsel %vm511_vm2, %v956_v16, 0  ;;  %v2541_v16 = vld [vmem:[#allocation7 + $0x18] sm:$0xff]  }
 0x8bb   :  { %2417 = vmatpush3.bf16.msra.mxu0 %v961_v17  ;;  %v2542_v17 = vld [vmem:[#allocation7 + $0x20] sm:$0xff]  }
 0x8bc   :  { %v2651_v18 = vpop.eup %2650  ;;  %2428 = vmatprep.subr.bf16.mxu0 %v2837_v4 }
 0x8bd   :  { %v951_v20 = vmul.f32 %v2651_v18, %v2647_v54  ;;  %v1052_v27 = vpop.permute.xlu0 %1051  ;;  %v2543_v18 = vld [vmem:[#allocation7 + $0x28] sm:$0xff]  }
 0x8bf   :  { %v953_v21 = vpack.c.bf16 %v951_v20, %v951_v20  ;;  %v2545_v20 = vld [vmem:[#allocation7 + $0x38] sm:$0xff]  }
 0x8c0   :  { %v2653_v22 = vpop.eup %2652 }
 0x8c1   :  { %v952_v23 = vmul.f32 %v2653_v22, %v2649_v13  ;;  %2419 = vmatmul.mubr.msk.bf16.vlgmr.msra.gmra.mrb[16].mxu0 %vm483_vm4, %v953_v21 }
 0x8c2   :  { %2430 = vmatprep.mubr.msk.bf16.mxu0 %vm2839_vm0, %v2837_v4 }
 0x8c3   :  { %v954_v25 = vpack.c.bf16 %v952_v23, %v952_v23 }
 0x8c4   :  { %2429 = vmatpush3.bf16.xpose.msra.mxu0 %v1059_v61 }
 0x8c5   :  { %2425 = vmatmul.mubr.msk.bf16.vlgmr.msra.gmra.mrb[32].mxu1 %vm483_vm4, %v954_v25  ;;  %2440 = vmatprep.subr.bf16.mxu0 %v2837_v4 }
 0x8c6   :  { %2435 = vmatpush3.bf16.xpose.msra.mxu1 %v1109_v26  ;;  %2436 = vmatprep.mubr.msk.bf16.mxu1 %vm2839_vm0, %v2837_v4 }
 0x8c7   :  { %2446 = vmatprep.subr.bf16.mxu1 %v2837_v4 }
 0x8cb   :  { %2431 = vmatmul.mubr.msk.bf16.vlgmr.msra.gmra.mrb[20].mxu0 %vm386_vm1, %v1052_v27 }
 0x8cc   :  { %2442 = vmatprep.mubr.msk.bf16.mxu0 %vm2839_vm0, %v2837_v4 }
 0x8cd   :  { %2437 = vmatmul.mubr.msk.bf16.vlgmr.msra.gmra.mrb[36].mxu1 %vm386_vm1, %v1102_v28 }
 0x8ce   :  { %2448 = vmatprep.mubr.msk.bf16.mxu1 %vm2839_vm0, %v2837_v4 }
 0x994   :  { %v997_v29 = vpop.f32.mrb[16].mxu0 }
 0x995   :  { %v2420_v31 = vpop.f32.mrb[17].mxu0 }
 0x996   :  { %v1000_v32 = vpop.f32.mrb[18].mxu0 }
 0x997   :  { %v2421_v33 = vpop.f32.mrb[19].mxu0 }
 0x998   :  { %v1045_v34 = vpop.f32.mrb[32].mxu1 }
 0x999   :  { %v2496_v35 = vpack.i.bf16 %v1045_v34, %v997_v29  ;;  %v2426_v37 = vpop.f32.mrb[33].mxu1 }
 0x99a   :  { %v1048_v38 = vpop.f32.mrb[34].mxu1 }
 0x99b   :  { %v2427_v40 = vpop.f32.mrb[35].mxu1 }
 0x99e   :  { %v1095_v41 = vpop.f32.mrb[20].mxu0 }
 0x99f   :  { %v1151_v42 = vsel %vm3009_vm3, %v1095_v41, -inf  ;;  %v2432_v45 = vpop.f32.mrb[21].mxu0 }
 0x9a0   :  { %v1098_v46 = vpop.f32.mrb[22].mxu0  ;;  %v1145_v47 = vpop.f32.mrb[36].mxu1  ;;  %v1153_v48 = vsel %vm483_vm4, %v1151_v42, -inf }
 0x9a1   :  { %v1152_v49 = vsel %vm3009_vm3, %v1145_v47, -inf  ;;  %1154 = vmax.xlane.f32.xlu0 %v1153_v48  ;;  %v2433_v50 = vpop.f32.mrb[23].mxu0  ;;  %v2438_v52 = vpop.f32.mrb[37].mxu1 }
 0x9a2   :  { %v1148_v53 = vpop.f32.mrb[38].mxu1  ;;  %v1156_v55 = vsel %vm483_vm4, %v1152_v49, -inf  ;;  %v2682_v50 = vld [vmem:[#allocation2] sm:$0xff] }
 0x9a3   :  { %1157 = vmax.xlane.f32.xlu1 %v1156_v55  ;;  %v2439_v56 = vpop.f32.mrb[39].mxu1 }
 0x9b4   :  { %1225 = vrot.lane.b32.xlu1 %v3033_v36, %s2841_s20 }
 0x9b8   :  { %2492 = vrot.lane.b32.xlu1 %v2491_v44, %s2841_s20 }
 0x9bc   :  { %2497 = vrot.lane.b32.xlu1 %v2496_v35, %s2834_s0 }
 0xa2e   :  { %v1155_v6 = vpop.xlane.xlu0 %1154 }
 0xa2f   :  { %v1159_v58 = vsub.f32 %v1151_v42, %v1155_v6  ;;  %v2546_v6 = vld [vmem:[#allocation8] ss:$16 sps:$4 sm:$0xff]  }
 0xa30   :  { %v1158_v59 = vpop.xlane.xlu1 %1157 }
 0xa31   :  { %v1161_v62 = vmul.f32 1.442695, %v1159_v58  ;;  %v1160_v1 = vsub.f32 %v1152_v49, %v1158_v59  ;;  %v2548_v58 = vld [vmem:[#allocation8 + $0x4] ss:$16 sps:$4 sm:$0xff]   ;;  %v2549_v59 = vld [vmem:[#allocation8 + $0x8] ss:$16 sps:$4 sm:$0xff]  }
 0xa33   :  { %2654 = vpow2.f32 %v1161_v62  ;;  %v1163_v2 = vmul.f32 1.442695, %v1160_v1  ;;  %v2551_v62 = vld [vmem:[#allocation8 + $0xc] ss:$16 sps:$4 sm:$0xff]   ;;  %v2554_v1 = vld [vmem:[#allocation8 + $0x24] ss:$16 sps:$4 sm:$0xff]  }
 0xa34   :  { %v1226_v3 = vpop.permute.xlu1 %1225 }
 0xa35   :  { %2656 = vpow2.f32 %v1163_v2  ;;  %v1231_v5 = vsel %vm511_vm2, %v1226_v3, 0  ;;  %v2552_v2 = vld [vmem:[#allocation8 + $0x20] ss:$16 sps:$4 sm:$0xff]   ;;  %v2555_v3 = vld [vmem:[#allocation8 + $0x28] ss:$16 sps:$4 sm:$0xff]  }
 0xa36   :  { %2447 = vmatpush3.bf16.msra.mxu1 %v1231_v5 }
 0xa37   :  { %1637 = vmatprep.subr.bf16.mxu1 %v2548_v58  ;;  %v2603_v58 = vld [vmem:[#allocation10 + $0xd0] sm:$0xff]  }
 0xa38   :  { %v2493_v29 = vpop.permute.xlu1 %2492 }
 0xa39   :  { %v2495_v32 = vunpack.i.h.bf16 %v2493_v29  ;;  %v2494_v33 = vunpack.i.l.bf16 %v2493_v29  ;;  %v2594_v29 = vld [vmem:[#allocation10 + $0x40] sm:$0xff]  }
 0xa3b   :  { %v1298_v37 = vsel %vm386_vm1, %v3057_v57, %v2495_v32  ;;  %v1297_v38 = vsel %vm386_vm1, %v3055_v51, %v2494_v33  ;;  %v2683_v57 = vld [vmem:[#allocation2 + $0x8] sm:$0xff] }
 0xa3c   :  { %v2498_v31 = vpop.permute.xlu1 %2497 }
 0xa3d   :  { %v2655_v36 = vpop.eup %2654  ;;  %v2500_v34 = vunpack.i.h.bf16 %v2498_v31  ;;  %v2499_v35 = vunpack.i.l.bf16 %v2498_v31  ;;  %v2595_v31 = vld [vmem:[#allocation10 + $0xc0] sm:$0xff]  }
 0xa3e   :  { %v1165_v7 = vsel %vm483_vm4, %v2655_v36, 0.0 }
 0xa3f   :  { %v2657_v8 = vpop.eup %2656  ;;  %1166 = vadd.xlane.f32.xlu0 %v1165_v7  ;;  %v1300_v42 = vsel %vm1299_vm5, %v1297_v38, %v2499_v35  ;;  %v1301_v45 = vsel %vm1299_vm5, %v1298_v37, %v2500_v34 }
 0xa40   :  { %v1168_v39 = vsel %vm483_vm4, %v2657_v8, 0.0 }
 0xa43   :  { %1169 = vadd.xlane.f32.xlu0 %v1168_v39 }
 0xa59   :  { %1177 = vrot.lane.b32.xlu0 %v2998_v63, %s2841_s20 }
 0xacc   :  { %v1167_v43 = vpop.xlane.xlu0 %1166 }
 0xacd   :  { %2658 = vrcp.f32 %v1167_v43 }
 0xad0   :  { %v1170_v44 = vpop.xlane.xlu0 %1169 }
 0xad1   :  { %2660 = vrcp.f32 %v1170_v44 }
 0xad4   :  { %v1178_v9 = vpop.permute.xlu0 %1177 }
 0xad5   :  { %v1183_v10 = vsel %vm511_vm2, %v1178_v9, 0 }
 0xad6   :  { %2441 = vmatpush3.bf16.msra.mxu0 %v1183_v10  ;;  %v2560_v10 = vld [vmem:[#allocation8 + $0x44] ss:$16 sps:$4 sm:$0xff]  }
 0xad7   :  { %v2659_v11 = vpop.eup %2658  ;;  %2452 = vmatprep.subr.bf16.mxu0 %v2837_v4 }
 0xad8   :  { %v1173_v12 = vmul.f32 %v2659_v11, %v2655_v36  ;;  %v2563_v11 = vld [vmem:[#allocation8 + $0x4c] ss:$16 sps:$4 sm:$0xff]  }
 0xada   :  { %v1175_v54 = vpack.c.bf16 %v1173_v12, %v1173_v12  ;;  %v2558_v12 = vld [vmem:[#allocation8 + $0x40] ss:$16 sps:$4 sm:$0xff]  }
 0xadb   :  { %v2661_v60 = vpop.eup %2660 }
 0xadc   :  { %v1174_v13 = vmul.f32 %v2661_v60, %v2657_v8  ;;  %2443 = vmatmul.mubr.msk.bf16.vlgmr.msra.gmra.mrb[24].mxu0 %vm483_vm4, %v1175_v54  ;;  %v2561_v54 = vld [vmem:[#allocation8 + $0x48] ss:$16 sps:$4 sm:$0xff]   ;;  %v2566_v60 = vld [vmem:[#allocation8 + $0x64] ss:$16 sps:$4 sm:$0xff]  }
 0xadd   :  { %2468 = vmatprep.mubr.msk.bf16.mxu0 %vm2839_vm0, %v2837_v4  ;;  %2453 = vmatpush3.bf16.msra.mxu0 %v2538_v0  ;;  %v2567_v0 = vld [vmem:[#allocation8 + $0x68] ss:$16 sps:$4 sm:$0xff]  }
 0xade   :  { %v1176_v63 = vpack.c.bf16 %v1174_v13, %v1174_v13  ;;  %2454 = vmatprep.subr.bf16.mxu0 %v2837_v4  ;;  %v2569_v13 = vld [vmem:[#allocation8 + $0x6c] ss:$16 sps:$4 sm:$0xff]  }
 0xae0   :  { %2449 = vmatmul.mubr.msk.bf16.vlgmr.msra.gmra.mrb[40].mxu1 %vm483_vm4, %v1176_v63  ;;  %v2564_v63 = vld [vmem:[#allocation8 + $0x60] ss:$16 sps:$4 sm:$0xff]  }
 0xae1   :  { %1669 = vmatprep.mubr.bf16.mxu1 %v2838_v30  ;;  %2455 = vmatpush3.bf16.msra.mxu0 %v2539_v14  ;;  %v2570_v14 = vld [vmem:[#allocation8 + $0x80] ss:$16 sps:$4 sm:$0xff]  }
 0xae2   :  { %2456 = vmatprep.subr.bf16.mxu0 %v2837_v4  ;;  %1638 = vmatpush1.bf16.msra.mxu1 %v2546_v6  ;;  %v2602_v6 = vld [vmem:[#allocation10 + $0x50] sm:$0xff]  }
 0xae3   :  { %1639 = vmatprep.subr.bf16.mxu1 %v2554_v1  ;;  %v2606_v1 = vld [vmem:[#allocation10 + $0x58] sm:$0xff]  }
 0xae5   :  { %2457 = vmatpush3.bf16.msra.mxu0 %v2540_v15  ;;  %v2572_v15 = vld [vmem:[#allocation8 + $0x84] ss:$16 sps:$4 sm:$0xff]  }
 0xae6   :  { %2458 = vmatprep.subr.bf16.mxu0 %v2837_v4  ;;  %1640 = vmatpush1.bf16.msra.mxu1 %v2552_v2  ;;  %v2608_v2 = vld [vmem:[#allocation10 + $0x18] sm:$0xff]  }
 0xae7   :  { %1641 = vmatprep.subr.bf16.mxu1 %v2560_v10  ;;  %v2618_v10 = vld [vmem:[#allocation10 + $0x70] sm:$0xff]  }
 0xae9   :  { %2459 = vmatpush3.bf16.msra.mxu0 %v2541_v16  ;;  %v2573_v16 = vld [vmem:[#allocation8 + $0x88] ss:$16 sps:$4 sm:$0xff]  }
 0xaea   :  { %2460 = vmatprep.subr.bf16.mxu0 %v2837_v4  ;;  %1642 = vmatpush1.bf16.msra.mxu1 %v2558_v12  ;;  %v2620_v12 = vld [vmem:[#allocation10 + $0x30] sm:$0xff]  }
 0xaeb   :  { %1643 = vmatprep.subr.bf16.mxu1 %v2566_v60  ;;  %v2622_v60 = vld [vmem:[#allocation10 + $0x78] sm:$0xff]  }
 0xaed   :  { %2461 = vmatpush3.bf16.msra.mxu0 %v2542_v17  ;;  %v2575_v17 = vld [vmem:[#allocation8 + $0x8c] ss:$16 sps:$4 sm:$0xff]  }
 0xaee   :  { %2462 = vmatprep.subr.bf16.mxu0 %v2837_v4  ;;  %1644 = vmatpush1.bf16.msra.mxu1 %v2564_v63  ;;  %v2624_v63 = vld [vmem:[#allocation10 + $0x38] sm:$0xff]  }
 0xaef   :  { %1645 = vmatprep.subr.bf16.mxu1 %v2572_v15 }
 0xaf1   :  { %2463 = vmatpush3.bf16.msra.mxu0 %v2543_v18  ;;  %v2578_v18 = vld [vmem:[#allocation8 + $0xa4] ss:$16 sps:$4 sm:$0xff]  }
 0xaf2   :  { %2464 = vmatprep.subr.bf16.mxu0 %v2837_v4  ;;  %1646 = vmatpush1.bf16.msra.mxu1 %v2570_v14 }
 0xaf3   :  { %1647 = vmatprep.subr.bf16.mxu1 %v2578_v18 }
 0xaf5   :  { %2465 = vmatpush3.bf16.msra.mxu0 %v2544_v19  ;;  %v2581_v19 = vld [vmem:[#allocation8 + $0xac] ss:$16 sps:$4 sm:$0xff]  }
 0xaf6   :  { %2466 = vmatprep.subr.bf16.mxu0 %v2837_v4 }
 0xaf9   :  { %2467 = vmatpush3.bf16.msra.mxu0 %v2545_v20  ;;  %v2576_v20 = vld [vmem:[#allocation8 + $0xa0] ss:$16 sps:$4 sm:$0xff]  }
 0xafa   :  { %1680 = vmatprep.subr.bf16.mxu0 %v2551_v62  ;;  %1648 = vmatpush1.bf16.msra.mxu1 %v2576_v20  ;;  %v2605_v62 = vld [vmem:[#allocation10 + $0x90] sm:$0xff]  }
 0xbaf   :  { %v1219_v21 = vpop.f32.mrb[24].mxu0 }
 0xbb0   :  { %v2444_v22 = vpop.f32.mrb[25].mxu0 }
 0xbb1   :  { %v1222_v23 = vpop.f32.mrb[26].mxu0  ;;  %v2584_v22 = vld [vmem:[#allocation8 + $0xc4] ss:$16 sps:$4 sm:$0xff]  }
 0xbb2   :  { %v2445_v24 = vpop.f32.mrb[27].mxu0  ;;  %v2587_v23 = vld [vmem:[#allocation8 + $0xcc] ss:$16 sps:$4 sm:$0xff]   ;;  %1649 = vmatprep.subr.bf16.mxu1 %v2584_v22 }
 0xbb3   :  { %v1267_v61 = vpop.f32.mrb[40].mxu1  ;;  %v2582_v24 = vld [vmem:[#allocation8 + $0xc0] ss:$16 sps:$4 sm:$0xff]  }
 0xbb4   :  { %v2501_v25 = vpack.i.bf16 %v1267_v61, %v1219_v21  ;;  %v2450_v26 = vpop.f32.mrb[41].mxu1  ;;  %v2579_v21 = vld [vmem:[#allocation8 + $0xa8] ss:$16 sps:$4 sm:$0xff]   ;;  %1650 = vmatpush1.bf16.msra.mxu1 %v2582_v24 }
 0xbb5   :  { %v1270_v27 = vpop.f32.mrb[42].mxu1  ;;  %v2585_v61 = vld [vmem:[#allocation8 + $0xc8] ss:$16 sps:$4 sm:$0xff]   ;;  %v2593_v26 = vld [vmem:[#allocation8 + $0xec] ss:$16 sps:$4 sm:$0xff]  }
 0xbb6   :  { %2502 = vrot.lane.b32.xlu0 %v2501_v25, %s2840_s1  ;;  %v2451_v28 = vpop.f32.mrb[43].mxu1  ;;  %v2590_v25 = vld [vmem:[#allocation8 + $0xe4] ss:$16 sps:$4 sm:$0xff]   ;;  %v2588_v27 = vld [vmem:[#allocation8 + $0xe0] ss:$16 sps:$4 sm:$0xff]  }
 0xbb7   :  { %1651 = vmatprep.subr.bf16.mxu1 %v2590_v25  ;;  %v2591_v28 = vld [vmem:[#allocation8 + $0xe8] ss:$16 sps:$4 sm:$0xff]  }
 0xbb8   :  { %1652 = vmatpush1.bf16.msra.mxu1 %v2588_v27 }
 0xbb9   :  { %2292 = vmatprep.subr.bf16.mxu1 %v2594_v29 }
 0xc28   :  { %v2503_v4 = vpop.permute.xlu0 %2502 }
 0xc29   :  { %v2505_v40 = vunpack.i.h.bf16 %v2503_v4  ;;  %v2504_v41 = vunpack.i.l.bf16 %v2503_v4 }
 0xc2b   :  { %v1304_v46 = vsel %vm1302_vm6, %v1301_v45, %v2505_v40  ;;  %v1303_v47 = vsel %vm1302_vm6, %v1300_v42, %v2504_v41  ;;  %v2177_v42 = vld [vmem:[%s3220_s2] ss:$0 sm:$0xff]  ;;  %s2842_s2 = smov [#allocation11]  }
 0xc2c   :  { %v1305_v48 = vpack.c.bf16 %v1304_v46, %v1303_v47  ;;  %s2114_s23 = sshll.u32 %s2842_s2, 4  ;;  %s2115_s23 = int_to_ptr.vmem [resolvable:$true] %s2114_s23 }
 0xc2d   :  { %s2794_s24 = scalar_lea.vmem %s2115_s23, 256  ;;  %p2799_p13 = scmp.lt.s32.totalorder %s2115_s23, %s2115_s23 }
 0xc2e   :  { %2469 = vmatmul.mubr.bf16.vlgmr.msra.gmra.mrb[28].mxu0 %v1305_v48  ;;  %v2596_v48 = vld [vmem:[#allocation10] sm:$0xff]   ;;  %p2795_p12 = scmp.ne.s32.totalorder %s2115_s23, %s2794_s24  ;;  %p2800_p0 = scmp.lt.s32.totalorder %s2794_s24, %s2794_s24 }
 0xc2f   :  { %1712 = vmatprep.mubr.bf16.mxu0 %v2838_v30  ;;  %v2557_v30 = vld [vmem:[#allocation8 + $0x2c] ss:$16 sps:$4 sm:$0xff]   ;;  %1681 = vmatpush1.bf16.msra.mxu0 %v2549_v59  ;;  %v2604_v59 = vld [vmem:[#allocation10 + $0x10] sm:$0xff]  }
 0xc30   :  { %1682 = vmatprep.subr.bf16.mxu0 %v2557_v30  ;;  %v2607_v30 = vld [vmem:[#allocation10 + $0xd8] sm:$0xff]   ;;  %p2801_p1 = por %p2800_p0, %p2799_p13 }
 0xc32   :  { %p2802_p2 = pnand %p2801_p1, %p2795_p12 }
 0xc33   :  { %1683 = vmatpush1.bf16.msra.mxu0 %v2555_v3  ;;  %v2609_v3 = vld [vmem:[#allocation10 + $0x98] sm:$0xff]  }
 0xc34   :  { %1684 = vmatprep.subr.bf16.mxu0 %v2563_v11  ;;  %v2619_v11 = vld [vmem:[#allocation10 + $0xf0] sm:$0xff]  }
 0xc37   :  { %1685 = vmatpush1.bf16.msra.mxu0 %v2561_v54  ;;  %v2621_v54 = vld [vmem:[#allocation10 + $0xb0] sm:$0xff]  }
 0xc38   :  { %1686 = vmatprep.subr.bf16.mxu0 %v2569_v13  ;;  %v2623_v13 = vld [vmem:[#allocation10 + $0xf8] sm:$0xff]  }
 0xc3b   :  { %1687 = vmatpush1.bf16.msra.mxu0 %v2567_v0  ;;  %v2625_v0 = vld [vmem:[#allocation10 + $0xb8] sm:$0xff]  }
 0xc3c   :  { %1688 = vmatprep.subr.bf16.mxu0 %v2575_v17 }
 0xc3f   :  { %1689 = vmatpush1.bf16.msra.mxu0 %v2573_v16 }
 0xc40   :  { %1690 = vmatprep.subr.bf16.mxu0 %v2581_v19 }
 0xc43   :  { %1691 = vmatpush1.bf16.msra.mxu0 %v2579_v21 }
 0xc44   :  { %1692 = vmatprep.subr.bf16.mxu0 %v2587_v23 }
 0xc47   :  { %1693 = vmatpush1.bf16.msra.mxu0 %v2585_v61 }
 0xc48   :  { %1694 = vmatprep.subr.bf16.mxu0 %v2593_v26 }
 0xc4b   :  { %1695 = vmatpush1.bf16.msra.mxu0 %v2591_v28 }
 0xc4c   :  { %2314 = vmatprep.subr.bf16.mxu0 %v2595_v31 }
 0xd01   :  { %v1404_v49 = vpop.f32.mrb[28].mxu0 }
 0xd02   :  { %v3180_v52 = vadd.f32 %v2682_v50, %v1404_v49  ;;  %v2470_v53 = vpop.f32.mrb[29].mxu0  ;;  %v2597_v49 = vld [vmem:[#allocation10 + $0x80] sm:$0xff]  }
 0xd03   :  { %v1407_v55 = vpop.f32.mrb[30].mxu0  ;;  %v2598_v53 = vld [vmem:[#allocation10 + $0x48] sm:$0xff]  }
 0xd04   :  { %v3182_v56 = vadd.f32 %v2683_v57, %v1407_v55  ;;  %1414 = vadd.xlane.f32.xlu1 %v3180_v52  ;;  %v2471_v51 = vpop.f32.mrb[31].mxu0  ;;  %v2599_v55 = vld [vmem:[#allocation10 + $0xc8] sm:$0xff]  }
 0xd05   :  { %v2600_v57 = vld [vmem:[#allocation10 + $0x8] sm:$0xff]  }
 0xd06   :  { %1416 = vadd.xlane.f32.xlu0 %v3182_v56  ;;  %v2601_v51 = vld [vmem:[#allocation10 + $0x88] sm:$0xff]  }
 0xd91   :  { %v1415_v5 = vpop.xlane.xlu1 %1414 }
 0xd92   :  { %v1418_v36 = vmul.f32 0.0078125, %v1415_v5  ;;  %v2610_v5 = vld [vmem:[#allocation10 + $0x60] sm:$0xff]  }
 0xd93   :  { %v1417_v7 = vpop.xlane.xlu0 %1416 }
 0xd94   :  { %v3187_v8 = vsub.f32 %v3180_v52, %v1418_v36  ;;  %v1419_v39 = vmul.f32 0.0078125, %v1417_v7  ;;  %v2611_v36 = vld [vmem:[#allocation10 + $0xe0] sm:$0xff]  }
 0xd95   :  { %v2612_v7 = vld [vmem:[#allocation10 + $0x20] sm:$0xff]  }
 0xd96   :  { %v3190_v43 = vsub.f32 %v3182_v56, %v1419_v39  ;;  %v1422_v44 = vmul.f32 %v3187_v8, %v3187_v8  ;;  %v2614_v39 = vld [vmem:[#allocation10 + $0x68] sm:$0xff]  }
 0xd98   :  { %1424 = vadd.xlane.f32.xlu0 %v1422_v44  ;;  %v1423_v9 = vmul.f32 %v3190_v43, %v3190_v43  ;;  %v2616_v44 = vld [vmem:[#allocation10 + $0x28] sm:$0xff]  }
 0xd9c   :  { %1426 = vadd.xlane.f32.xlu0 %v1423_v9  ;;  %v2617_v9 = vld [vmem:[#allocation10 + $0xa8] sm:$0xff]  }
 0xe25   :  { %v1425_v32 = vpop.xlane.xlu0 %1424 }
 0xe26   :  { %v1428_v33 = vmul.f32 0.0078125, %v1425_v32 }
 0xe28   :  { %v1430_v34 = vadd.f32 1e-05, %v1428_v33 }
 0xe29   :  { %v1427_v35 = vpop.xlane.xlu0 %1426 }
 0xe2a   :  { %2662 = vrsqrt.f32 %v1430_v34  ;;  %v1429_v4 = vmul.f32 0.0078125, %v1427_v35 }
 0xe2c   :  { %v1431_v37 = vadd.f32 1e-05, %v1429_v4 }
 0xe2e   :  { %2664 = vrsqrt.f32 %v1431_v37 }
 0xe34   :  { %v2663_v38 = vpop.eup %2662 }
 0xe35   :  { %v1434_v40 = vmul.f32 %v2663_v38, %v3187_v8  ;;  %v2613_v8 = vld [vmem:[#allocation10 + $0xa0] sm:$0xff]  }
 0xe37   :  { %v1442_v46 = vmul.f32 %v2177_v42, %v1434_v40 }
 0xe38   :  { %v2665_v41 = vpop.eup %2664 }
 0xe39   :  { %v1435_v45 = vmul.f32 %v2665_v41, %v3190_v43  ;;  %v2615_v43 = vld [vmem:[#allocation10 + $0xe8] sm:$0xff]  }
 0xe3b   :  { %v1443_v47 = vmul.f32 %v2177_v42, %v1435_v45 }
 0xe3d   :  { %v1444_v50 = vpack.c.bf16 %v1443_v47, %v1442_v46 }
 0xe3f   :  { %1670 = vmatmul.mubr.bf16.vlgmr.msra.gmra.mrb[44].mxu1 %v1444_v50  ;;  %1713 = vmatmul.mubr.bf16.vlgmr.msra.gmra.mrb[32].mxu0 %v1444_v50 }
 0xe40   :  { %2293 = vmatpush3.bf16.msra.mxu1 %v2596_v48  ;;  %2315 = vmatpush3.bf16.msra.mxu0 %v2597_v49 }
 0xe41   :  { %2294 = vmatprep.subr.bf16.mxu1 %v2598_v53  ;;  %2316 = vmatprep.subr.bf16.mxu0 %v2599_v55 }
 0xe44   :  { %2295 = vmatpush3.bf16.msra.mxu1 %v2600_v57  ;;  %2317 = vmatpush3.bf16.msra.mxu0 %v2601_v51 }
 0xe45   :  { %2296 = vmatprep.subr.bf16.mxu1 %v2602_v6  ;;  %2318 = vmatprep.subr.bf16.mxu0 %v2603_v58 }
 0xe48   :  { %2297 = vmatpush3.bf16.msra.mxu1 %v2604_v59  ;;  %2319 = vmatpush3.bf16.msra.mxu0 %v2605_v62 }
 0xe49   :  { %2298 = vmatprep.subr.bf16.mxu1 %v2606_v1  ;;  %2320 = vmatprep.subr.bf16.mxu0 %v2607_v30 }
 0xe4c   :  { %2299 = vmatpush3.bf16.msra.mxu1 %v2608_v2  ;;  %2321 = vmatpush3.bf16.msra.mxu0 %v2609_v3 }
 0xe4d   :  { %2300 = vmatprep.subr.bf16.mxu1 %v2610_v5  ;;  %2322 = vmatprep.subr.bf16.mxu0 %v2611_v36 }
 0xe50   :  { %2301 = vmatpush3.bf16.msra.mxu1 %v2612_v7  ;;  %2323 = vmatpush3.bf16.msra.mxu0 %v2613_v8 }
 0xe51   :  { %2302 = vmatprep.subr.bf16.mxu1 %v2614_v39  ;;  %2324 = vmatprep.subr.bf16.mxu0 %v2615_v43 }
 0xe54   :  { %2303 = vmatpush3.bf16.msra.mxu1 %v2616_v44  ;;  %2325 = vmatpush3.bf16.msra.mxu0 %v2617_v9 }
 0xe55   :  { %2304 = vmatprep.subr.bf16.mxu1 %v2618_v10  ;;  %2326 = vmatprep.subr.bf16.mxu0 %v2619_v11 }
 0xe58   :  { %2305 = vmatpush3.bf16.msra.mxu1 %v2620_v12  ;;  %2327 = vmatpush3.bf16.msra.mxu0 %v2621_v54 }
 0xe59   :  { %2306 = vmatprep.subr.bf16.mxu1 %v2622_v60  ;;  %2328 = vmatprep.subr.bf16.mxu0 %v2623_v13 }
 0xe5c   :  { %2307 = vmatpush3.bf16.msra.mxu1 %v2624_v63  ;;  %2329 = vmatpush3.bf16.msra.mxu0 %v2625_v0 }
 0xf12   :  { %v1671_v14 = vpop.f32.mrb[44].mxu1  ;;  %v1714_v15 = vpop.f32.mrb[32].mxu0 }
 0xf13   :  { %v1731_v16 = vmul.f32 0.70710677, %v1671_v14  ;;  %v1733_v17 = vmul.f32 0.70710677, %v1714_v15  ;;  %v1673_v18 = vpop.f32.mrb[45].mxu1  ;;  %v1716_v19 = vpop.f32.mrb[33].mxu0 }
 0xf14   :  { %v1732_v20 = vmul.f32 0.70710677, %v1673_v18  ;;  %v1675_v21 = vpop.f32.mrb[46].mxu1  ;;  %v1718_v22 = vpop.f32.mrb[34].mxu0  ;;  %v1734_v23 = vmul.f32 0.70710677, %v1716_v19 }
 0xf15   :  { %2666 = verf.f32 %v1731_v16  ;;  %v1735_v24 = vmul.f32 0.70710677, %v1675_v21  ;;  %v1677_v61 = vpop.f32.mrb[47].mxu1  ;;  %v1737_v25 = vmul.f32 0.70710677, %v1718_v22  ;;  %v1720_v26 = vpop.f32.mrb[35].mxu0 }
 0xf16   :  { %2668 = verf.f32 %v1733_v17  ;;  %v1736_v27 = vmul.f32 0.70710677, %v1677_v61  ;;  %v1738_v28 = vmul.f32 0.70710677, %v1720_v26  ;;  %v1723_v4 = vmul.f32 0.5, %v1671_v14 }
 0xf17   :  { %2670 = verf.f32 %v1732_v20  ;;  %v1725_v37 = vmul.f32 0.5, %v1714_v15  ;;  %v1724_v41 = vmul.f32 0.5, %v1673_v18  ;;  %v1727_v45 = vmul.f32 0.5, %v1675_v21 }
 0xf18   :  { %2672 = verf.f32 %v1734_v23  ;;  %v1726_v48 = vmul.f32 0.5, %v1716_v19  ;;  %v1729_v50 = vmul.f32 0.5, %v1718_v22  ;;  %v1728_v6 = vmul.f32 0.5, %v1677_v61 }
 0xf19   :  { %2674 = verf.f32 %v1735_v24  ;;  %v1730_v1 = vmul.f32 0.5, %v1720_v26 }
 0xf1a   :  { %2676 = verf.f32 %v1737_v25 }
 0xf1b   :  { %2678 = verf.f32 %v1736_v27 }
 0xf1c   :  { %2680 = verf.f32 %v1738_v28 }
 0xf1f   :  { %v2667_v29 = vpop.eup %2666 }
 0xf20   :  { %v2669_v31 = vpop.eup %2668  ;;  %v1747_v34 = vadd.f32 1.0, %v2667_v29 }
 0xf21   :  { %v2671_v32 = vpop.eup %2670  ;;  %v1749_v38 = vadd.f32 1.0, %v2669_v31 }
 0xf22   :  { %v2673_v33 = vpop.eup %2672  ;;  %v1748_v42 = vadd.f32 1.0, %v2671_v32  ;;  %v1755_v57 = vmul.f32 %v1747_v34, %v1723_v4 }
 0xf23   :  { %v2675_v35 = vpop.eup %2674  ;;  %v1750_v49 = vadd.f32 1.0, %v2673_v33  ;;  %v1757_v59 = vmul.f32 %v1749_v38, %v1725_v37 }
 0xf24   :  { %v2677_v40 = vpop.eup %2676  ;;  %v1751_v46 = vadd.f32 1.0, %v2675_v35  ;;  %v1756_v2 = vmul.f32 %v1748_v42, %v1724_v41 }
 0xf25   :  { %v2679_v47 = vpop.eup %2678  ;;  %v1753_v53 = vadd.f32 1.0, %v2677_v40  ;;  %v1758_v36 = vmul.f32 %v1750_v49, %v1726_v48 }
 0xf26   :  { %v2681_v55 = vpop.eup %2680  ;;  %v1759_v51 = vmul.f32 %v1751_v46, %v1727_v45  ;;  %v1752_v58 = vadd.f32 1.0, %v2679_v47 }
 0xf27   :  { %v1761_v62 = vmul.f32 %v1753_v53, %v1729_v50  ;;  %v1754_v30 = vadd.f32 1.0, %v2681_v55 }
 0xf28   :  { %v1763_v3 = vpack.c.bf16 %v1759_v51, %v1755_v57  ;;  %v1760_v5 = vmul.f32 %v1752_v58, %v1728_v6 }
 0xf29   :  { %v1765_v7 = vpack.c.bf16 %v1761_v62, %v1757_v59  ;;  %v1762_v8 = vmul.f32 %v1754_v30, %v1730_v1 }
 0xf2a   :  { %v1764_v39 = vpack.c.bf16 %v1760_v5, %v1756_v2 }
 0xf2b   :  { %v1766_v43 = vpack.c.bf16 %v1762_v8, %v1758_v36 }
 0xf2c   :  { %2055 = vmatprep.mubr.bf16.mxu1 %v1764_v39 }
 0xf2d   :  { %2096 = vmatprep.mubr.bf16.mxu0 %v1766_v43  ;;  %2056 = vmatmul.mubr.bf16.vlgmr.msra.gmra.mrb[48].mxu1 %v1763_v3 }
 0xf2e   :  { %2097 = vmatmul.mubr.bf16.vlgmr.msra.gmra.mrb[36].mxu0 %v1765_v7 }
0x1000   :  { %v2308_v44 = vpop.f32.mrb[48].mxu1 }
0x1001   :  { %v2330_v9 = vpop.f32.mrb[36].mxu0  ;;  %v2309_v10 = vpop.f32.mrb[49].mxu1 }
0x1002   :  { %v2310_v11 = vadd.f32 %v2309_v10, %v2308_v44  ;;  %v2331_v12 = vpop.f32.mrb[37].mxu0  ;;  %v2311_v54 = vpop.f32.mrb[50].mxu1 }
0x1003   :  { %v2332_v60 = vadd.f32 %v2331_v12, %v2330_v9  ;;  %v2333_v13 = vpop.f32.mrb[38].mxu0  ;;  %v2312_v63 = vpop.f32.mrb[51].mxu1 }
0x1004   :  { %v2313_v0 = vadd.f32 %v2312_v63, %v2311_v54  ;;  %v2334_v14 = vpop.f32.mrb[39].mxu0 }
0x1005   :  { %v2099_v15 = vadd.f32 %v2332_v60, %v2310_v11  ;;  %v2335_v16 = vadd.f32 %v2334_v14, %v2333_v13 }
0x1007   :  { %v2105_v17 = vadd.f32 %v2099_v15, %v3180_v52  ;;  %v2102_v18 = vadd.f32 %v2335_v16, %v2313_v0 }
0x1009   :  { %2107 = vst [vmem:[#allocation11] sm:$0xff] %v2105_v17  ;;  %v2106_v19 = vadd.f32 %v2102_v18, %v3182_v56 }
0x100b   :  { %2108 = vst [vmem:[#allocation11 + $0x8] sm:$0xff] %v2106_v19 }
0x100c   :  { %2805 = shalt.err (!%p2802_p2)
}
0x100d   :  { %s2806_s26 = scalar_lea.hbm %s3225_s7, 256 }
0x100e   :  { %p2807_p3 = scmp.ne.s32.totalorder %s3225_s7, %s2806_s26  ;;  %p2810_p4 = scmp.lt.u32.totalorder %s2806_s26, %s3225_s7 }
0x1010   :  { %p2812_p5 = pnand %p2810_p4, %p2807_p3 }
0x1012   :  { %2815 = shalt.err (!%p2812_p5)
}
0x1013   :  { %2120 = dma.vmem_to_hbm [thread:$0]  %s2115_s23, 256, %s3225_s7, [#allocation4], %s2831_s5, %s2831_s5, %s2832_s15  }
0x1014   :  { %2822 = dma.done.wait [#allocation4], 256  }
0x1015   :  { %2823 = vsyncadd [#allocation4], 4294967040 }
0x1016   :  { %2124 = vsyncpa [#allocation3], 1 }
0x1017   :  { %2125 = vsyncpa [#allocation6], 1 }
0x1018   :  { %2126 = vsyncpa [#allocation9], 1 }
0x1019   :  { %2127 = vsyncpa [#allocation4], 1 }

</bundles_post_ra>
